<compile_context>
chip_gen: v5e
topology: v5e:2x2
jax: 0.10.0
libtpu: 0.0.40
codegen_flags: <defaults>
</compile_context>

<pallas_src>
import functools
import math

import jax
import jax.numpy as jnp
from jax.experimental import pallas as pl
from jax.experimental.pallas import tpu as pltpu


# ---------------------------------------------------------------------------
# Kernel 1: fully fused per-sequence encoder + classifier
# ---------------------------------------------------------------------------

def _encoder_classifier_kernel(
        ids_ref, mask_ref,
        tok_ref, pos_ref, typ_ref, elng_ref, elnb_ref,
        wqkv_ref, bqkv_ref, wo_ref, bo_ref, ln1g_ref, ln1b_ref,
        w1_ref, b1_ref, w2_ref, b2_ref, ln2g_ref, ln2b_ref,
        cwi_ref, cbi_ref, chw_ref, chb_ref, cwo_ref, cbo_ref,
        out_ref, *, n_heads):
    S = ids_ref.shape[1]
    V, H = tok_ref.shape
    n_layers = wqkv_ref.shape[0]
    dh = H // n_heads
    scale = 1.0 / math.sqrt(dh)

    def layernorm(x, g, b):
        mu = jnp.mean(x, axis=-1, keepdims=True)
        xc = x - mu
        var = jnp.mean(xc * xc, axis=-1, keepdims=True)
        return xc * jax.lax.rsqrt(var + 1e-12) * g + b

    # ---- embeddings: gather expressed as one-hot @ table (MXU) ----
    ids = ids_ref[0]                                          # (S, 1) int32
    vocab_iota = jax.lax.broadcasted_iota(jnp.int32, (S, V), 1)
    one_hot = (vocab_iota == ids).astype(jnp.float32)         # (S, V)
    h = jnp.dot(one_hot, tok_ref[...], preferred_element_type=jnp.float32)
    h = h + pos_ref[...] + typ_ref[...]
    h = layernorm(h, elng_ref[...], elnb_ref[...])            # (S, H)

    # Additive attention bias (lengths >= 4 so no fully-masked row exists).
    neg_bias = (1.0 - mask_ref[0]) * (-1e9)                   # (1, S)

    # ---- transformer layers (unrolled; all weights stay resident in VMEM) --
    for l in range(n_layers):
        qkv = (jnp.dot(h, wqkv_ref[l], preferred_element_type=jnp.float32)
               + bqkv_ref[l])                                 # (S, 3H) fused QKV
        ctx_heads = []
        for hh in range(n_heads):
            q = qkv[:, hh * dh:(hh + 1) * dh]                 # (S, dh)
            k = qkv[:, H + hh * dh:H + (hh + 1) * dh]
            v = qkv[:, 2 * H + hh * dh:2 * H + (hh + 1) * dh]
            s = jax.lax.dot_general(q, k, (((1,), (1,)), ((), ())),
                                    preferred_element_type=jnp.float32)
            s = s * scale + neg_bias                          # (S, S)
            s = s - jnp.max(s, axis=-1, keepdims=True)
            p = jnp.exp(s)
            p = p * pl.reciprocal(jnp.sum(p, axis=-1, keepdims=True),
                                  approx=True)
            ctx_heads.append(jnp.dot(p, v,
                                     preferred_element_type=jnp.float32))
        ctx = jnp.concatenate(ctx_heads, axis=1)              # (S, H)

        attn_out = (jnp.dot(ctx, wo_ref[l],
                            preferred_element_type=jnp.float32) + bo_ref[l])
        h = layernorm(h + attn_out, ln1g_ref[l], ln1b_ref[l])

        ff = (jnp.dot(h, w1_ref[l], preferred_element_type=jnp.float32)
              + b1_ref[l])
        ff = jax.nn.gelu(ff, approximate=True)
        ff = (jnp.dot(ff, w2_ref[l], preferred_element_type=jnp.float32)
              + b2_ref[l])
        h = layernorm(h + ff, ln2g_ref[l], ln2b_ref[l])

    # ---- [CLS] hidden -> MLP classifier -> logit ----
    x = h[0:1, :]                                             # (1, H)
    x = jnp.dot(x, cwi_ref[...], preferred_element_type=jnp.float32) + cbi_ref[...]
    for i in range(chw_ref.shape[0]):
        x = jnp.dot(x, chw_ref[i], preferred_element_type=jnp.float32) + chb_ref[i]
        x = jnp.maximum(x, 0.0)
        # TODO(synk): nn.Dropout is identity at inference time; not implemented.
    logit = (jnp.dot(x, cwo_ref[...], preferred_element_type=jnp.float32)
             + cbo_ref[...])                                  # (1, 1)

    # Lane-dense output row (full 128-lane store; lane 0 is consumed outside).
    out_ref[...] = jnp.broadcast_to(logit, (1, 1, 128))


_WEIGHT_NAMES = ["tok_emb", "pos_emb", "type_emb", "emb_ln_g", "emb_ln_b",
                 "wqkv", "bqkv", "wo", "bo", "ln1_g", "ln1_b",
                 "w1", "b1", "w2", "b2", "ln2_g", "ln2_b",
                 "cls_w_in", "cls_b_in", "cls_hw", "cls_hb",
                 "cls_w_out", "cls_b_out"]


def encode_classify(params, ids3, mask3, n_heads):
    """ids3: (B*C, S, 1) int32; mask3: (B*C, 1, S) f32 -> logit slab (B*C,1,128)."""
    BC, S, _ = ids3.shape

    def full_spec(name):
        a = params[name]
        if a.ndim == 3:
            return pl.BlockSpec(a.shape, lambda b: (0, 0, 0))
        return pl.BlockSpec(a.shape, lambda b: (0, 0))

    in_specs = ([pl.BlockSpec((1, S, 1), lambda b: (b, 0, 0)),
                 pl.BlockSpec((1, 1, S), lambda b: (b, 0, 0))]
                + [full_spec(n) for n in _WEIGHT_NAMES])

    return pl.pallas_call(
        functools.partial(_encoder_classifier_kernel, n_heads=n_heads),
        out_shape=jax.ShapeDtypeStruct((BC, 1, 128), jnp.float32),
        grid=(BC,),
        in_specs=in_specs,
        out_specs=pl.BlockSpec((1, 1, 128), lambda b: (b, 0, 0)),
        compiler_params=pltpu.CompilerParams(
            dimension_semantics=("parallel",)),
    )(ids3, mask3, *[params[n] for n in _WEIGHT_NAMES])


# ---------------------------------------------------------------------------
# Kernel 2: argmax over choices + numerically stable BCE (from logits)
# ---------------------------------------------------------------------------

def _head_kernel(z_ref, a_ref, preds_ref, loss_ref):
    z = z_ref[...]                       # (B, C) pre-sigmoid logits
    a = a_ref[...]                       # (B, C) targets
    C = z.shape[1]
    # argmax over choices (sigmoid is monotone, so argmax(logits)==argmax(probs))
    col = jax.lax.broadcasted_iota(jnp.int32, z.shape, 1)
    maxv = jnp.max(z, axis=1, keepdims=True)
    cand = jnp.where(z == maxv, col, jnp.int32(C))
    preds_ref[...] = jnp.min(cand, axis=1, keepdims=True)
    # stable BCE: -(a*log(sigmoid(z)) + (1-a)*log(1-sigmoid(z)))
    bce = jnp.maximum(z, 0.0) - a * z + jnp.log(1.0 + jnp.exp(-jnp.abs(z)))
    loss_ref[...] = jnp.mean(bce, keepdims=True)


def head(logits, answer):
    B, C = logits.shape
    return pl.pallas_call(
        _head_kernel,
        out_shape=(jax.ShapeDtypeStruct((B, 1), jnp.int32),
                   jax.ShapeDtypeStruct((1, 1), jnp.float32)),
        grid=(1,),
        in_specs=[pl.BlockSpec((B, C), lambda i: (0, 0)),
                  pl.BlockSpec((B, C), lambda i: (0, 0))],
        out_specs=(pl.BlockSpec((B, 1), lambda i: (0, 0)),
                   pl.BlockSpec((1, 1), lambda i: (0, 0))),
    )(logits, answer)


# ---------------------------------------------------------------------------
# Forward pass (choice loop folded into the batch dimension)
# ---------------------------------------------------------------------------

def qa_forward(params, input_ids, attention_mask, answer, n_heads):
    """input_ids/attention_mask: (B, C, S); answer: (B, C) -> (preds, loss)."""
    B, C, S = input_ids.shape
    BC = B * C
    ids3 = input_ids.reshape(BC, S, 1).astype(jnp.int32)
    mask3 = attention_mask.reshape(BC, 1, S).astype(jnp.float32)

    slab = encode_classify(params, ids3, mask3, n_heads)      # (BC, 1, 128)
    logits = slab[:, 0, 0].reshape(B, C)                      # layout plumbing only

    preds, loss = head(logits, answer)
    return preds[:, 0], loss[0, 0]


# ---------------------------------------------------------------------------
# Deterministic parameter init (synthetic mini-BERT, not a checkpoint)
# ---------------------------------------------------------------------------

def init_params(key, *, vocab, seq, hidden, ffn, n_layers,
                cls_hidden_dim, n_cls_layers):
    kit = iter(jax.random.split(key, 3 + 6 * n_layers + 2 + n_cls_layers + 4))

    def nrm(shape):
        return 0.02 * jax.random.normal(next(kit), shape, dtype=jnp.float32)

    ones = lambda *s: jnp.ones(s, jnp.float32)
    zeros = lambda *s: jnp.zeros(s, jnp.float32)

    params = dict(
        tok_emb=nrm((vocab, hidden)),
        pos_emb=nrm((seq, hidden)),
        type_emb=nrm((1, hidden)),
        emb_ln_g=ones(1, hidden), emb_ln_b=zeros(1, hidden),
    )

    wqkv, bqkv, wo, bo = [], [], [], []
    ln1g, ln1b, w1, b1, w2, b2, ln2g, ln2b = ([] for _ in range(8))
    for _ in range(n_layers):
        wq, wk, wv = (nrm((hidden, hidden)) for _ in range(1)), None, None
        wq = nrm((hidden, hidden)); wk = nrm((hidden, hidden)); wv = nrm((hidden, hidden))
        wqkv.append(jnp.concatenate([wq, wk, wv], axis=1))    # fused (H, 3H)
        bqkv.append(zeros(1, 3 * hidden))
        wo.append(nrm((hidden, hidden))); bo.append(zeros(1, hidden))
        ln1g.append(ones(1, hidden)); ln1b.append(zeros(1, hidden))
        w1.append(nrm((hidden, ffn))); b1.append(zeros(1, ffn))
        w2.append(nrm((ffn, hidden))); b2.append(zeros(1, hidden))
        ln2g.append(ones(1, hidden)); ln2b.append(zeros(1, hidden))

    stack = lambda xs: jnp.stack(xs, axis=0)
    params.update(
        wqkv=stack(wqkv), bqkv=stack(bqkv), wo=stack(wo), bo=stack(bo),
        ln1_g=stack(ln1g), ln1_b=stack(ln1b),
        w1=stack(w1), b1=stack(b1), w2=stack(w2), b2=stack(b2),
        ln2_g=stack(ln2g), ln2_b=stack(ln2b),
    )

    params["cls_w_in"] = nrm((hidden, cls_hidden_dim))
    params["cls_b_in"] = zeros(1, cls_hidden_dim)
    params["cls_hw"] = stack([nrm((cls_hidden_dim, cls_hidden_dim))
                              for _ in range(n_cls_layers)])
    params["cls_hb"] = stack([zeros(1, cls_hidden_dim)
                              for _ in range(n_cls_layers)])
    params["cls_w_out"] = nrm((cls_hidden_dim, 1))
    params["cls_b_out"] = zeros(1, 1)
    return params


# ---------------------------------------------------------------------------
# Main
# ---------------------------------------------------------------------------

if __name__ == "__main__":
    B, NUM_CHOICES, S = 2, 3, 8            # batch, answer choices, seq length
    VOCAB, H, N_HEADS, FFN = 128, 32, 2, 64   # vocab padded to 128-lane width
    N_LAYERS, CLS_HIDDEN, N_CLS_LAYERS = 2, 32, 1

    key = jax.random.PRNGKey(0)
    k_ids, k_len, k_ans, k_par = jax.random.split(key, 4)

    input_ids = jax.random.randint(k_ids, (B, NUM_CHOICES, S), 0, VOCAB,
                                   dtype=jnp.int32)
    lengths = jax.random.randint(k_len, (B, NUM_CHOICES), 4, S + 1)
    attention_mask = (jnp.arange(S)[None, None, :] < lengths[:, :, None]
                      ).astype(jnp.float32)
    labels = jax.random.randint(k_ans, (B,), 0, NUM_CHOICES)
    answer = jax.nn.one_hot(labels, NUM_CHOICES, dtype=jnp.float32)

    params = init_params(k_par, vocab=VOCAB, seq=S, hidden=H, ffn=FFN,
                         n_layers=N_LAYERS, cls_hidden_dim=CLS_HIDDEN,
                         n_cls_layers=N_CLS_LAYERS)

    fwd = jax.jit(functools.partial(qa_forward, n_heads=N_HEADS))
    preds, loss = fwd(params, input_ids, attention_mask, answer)
    jax.block_until_ready((preds, loss))
    print("KERNEL_OK")
</pallas_src>

<mosaic_0001>
module attributes {stable_mosaic.version = 11 : i64} {
  func.func @_head_kernel(%arg0: i32, %arg1: memref<2x3xf32, #tpu.memory_space<vmem>>, %arg2: memref<2x3xf32, #tpu.memory_space<vmem>>, %arg3: memref<2x1xi32, #tpu.memory_space<vmem>>, %arg4: memref<1x1xf32, #tpu.memory_space<vmem>>) attributes {dimension_semantics = [#tpu.dimension_semantics<arbitrary>], iteration_bounds = array<i64: 1>, scalar_prefetch = 0 : i64, scratch_operands = 0 : i64, tpu.core_type = #tpu.core_type<tc>, window_params = [{pipeline_mode = #tpu.pipeline_mode<synchronous>, transform_indices = @transform_0, window_bounds = array<i64: 2, 3>}, {pipeline_mode = #tpu.pipeline_mode<synchronous>, transform_indices = @transform_1, window_bounds = array<i64: 2, 3>}, {pipeline_mode = #tpu.pipeline_mode<synchronous>, transform_indices = @transform_2, window_bounds = array<i64: 2, 1>}, {pipeline_mode = #tpu.pipeline_mode<synchronous>, transform_indices = @transform_3, window_bounds = array<i64: 1, 1>}]} {
    %c0 = arith.constant 0 : index
    %c0_0 = arith.constant 0 : index
    %0 = vector.load %arg1[%c0, %c0_0] : memref<2x3xf32, #tpu.memory_space<vmem>>, vector<2x3xf32>
    %c0_1 = arith.constant 0 : index
    %c0_2 = arith.constant 0 : index
    %1 = vector.load %arg2[%c0_1, %c0_2] : memref<2x3xf32, #tpu.memory_space<vmem>>, vector<2x3xf32>
    %2 = tpu.iota {dimensions = array<i32: 1>} : vector<2x3xi32>
    %cst = arith.constant dense<0xFF800000> : vector<2xf32>
    %3 = vector.multi_reduction <maximumf>, %0, %cst [1] : vector<2x3xf32> to vector<2xf32>
    %4 = vector.shape_cast %3 : vector<2xf32> to vector<2x1xf32>
    %5 = vector.broadcast %4 : vector<2x1xf32> to vector<2x3xf32>
    %6 = arith.cmpf oeq, %0, %5 : vector<2x3xf32>
    %c3_i32 = arith.constant 3 : i32
    %7 = vector.broadcast %c3_i32 : i32 to vector<2x3xi32>
    %8 = arith.select %6, %2, %7 : vector<2x3xi1>, vector<2x3xi32>
    %cst_3 = arith.constant dense<2147483647> : vector<2xi32>
    %9 = vector.multi_reduction <minsi>, %8, %cst_3 [1] : vector<2x3xi32> to vector<2xi32>
    %10 = vector.shape_cast %9 : vector<2xi32> to vector<2x1xi32>
    %c0_4 = arith.constant 0 : index
    %c0_5 = arith.constant 0 : index
    %11 = vector.load %arg3[%c0_4, %c0_5] : memref<2x1xi32, #tpu.memory_space<vmem>>, vector<2x1xi32>
    tpu.vector_store %arg3[%c0_4, %c0_5], %10 {strides = array<i32>} : memref<2x1xi32, #tpu.memory_space<vmem>>, vector<2x1xi32>,
    %cst_6 = arith.constant 0.000000e+00 : f32
    %12 = vector.broadcast %cst_6 : f32 to vector<2x3xf32>
    %13 = arith.maximumf %0, %12 : vector<2x3xf32>
    %14 = arith.mulf %1, %0 : vector<2x3xf32>
    %15 = arith.subf %13, %14 : vector<2x3xf32>
    %16 = math.absf %0 : vector<2x3xf32>
    %cst_7 = arith.constant 0.000000e+00 : f32
    %17 = vector.broadcast %cst_7 : f32 to vector<2x3xf32>
    %18 = arith.subf %17, %16 : vector<2x3xf32>
    %19 = math.exp %18 : vector<2x3xf32>
    %cst_8 = arith.constant 1.000000e+00 : f32
    %20 = vector.broadcast %cst_8 : f32 to vector<2x3xf32>
    %21 = arith.addf %20, %19 : vector<2x3xf32>
    %22 = math.log %21 : vector<2x3xf32>
    %23 = arith.addf %15, %22 : vector<2x3xf32>
    %24 = vector.shape_cast %23 : vector<2x3xf32> to vector<1x2x3xf32>
    %cst_9 = arith.constant dense<0.000000e+00> : vector<1xf32>
    %25 = vector.multi_reduction <add>, %24, %cst_9 [1, 2] : vector<1x2x3xf32> to vector<1xf32>
    %26 = vector.shape_cast %25 : vector<1xf32> to vector<1x1x1xf32>
    %27 = vector.extract %26[0, 0, 0] : f32 from vector<1x1x1xf32>
    %28 = vector.broadcast %27 : f32 to vector<1x1xf32>
    %cst_10 = arith.constant 6.000000e+00 : f32
    %29 = vector.broadcast %cst_10 : f32 to vector<1x1xf32>
    %30 = arith.divf %28, %29 : vector<1x1xf32>
    %c0_11 = arith.constant 0 : index
    %c0_12 = arith.constant 0 : index
    %31 = vector.load %arg4[%c0_11, %c0_12] : memref<1x1xf32, #tpu.memory_space<vmem>>, vector<1x1xf32>
    tpu.vector_store %arg4[%c0_11, %c0_12], %30 {strides = array<i32>} : memref<1x1xf32, #tpu.memory_space<vmem>>, vector<1x1xf32>,
    return
  }
  func.func @transform_0(%arg0: i32) -> (i32, i32) {
    %c0_i32 = arith.constant 0 : i32
    %c0_i32_0 = arith.constant 0 : i32
    %c0_i32_1 = arith.constant 0 : i32
    return %c0_i32, %c0_i32_0 : i32, i32
  }
  func.func @transform_1(%arg0: i32) -> (i32, i32) {
    %c0_i32 = arith.constant 0 : i32
    %c0_i32_0 = arith.constant 0 : i32
    %c0_i32_1 = arith.constant 0 : i32
    return %c0_i32, %c0_i32_0 : i32, i32
  }
  func.func @transform_2(%arg0: i32) -> (i32, i32) {
    %c0_i32 = arith.constant 0 : i32
    %c0_i32_0 = arith.constant 0 : i32
    %c0_i32_1 = arith.constant 0 : i32
    return %c0_i32, %c0_i32_0 : i32, i32
  }
  func.func @transform_3(%arg0: i32) -> (i32, i32) {
    %c0_i32 = arith.constant 0 : i32
    %c0_i32_0 = arith.constant 0 : i32
    %c0_i32_1 = arith.constant 0 : i32
    return %c0_i32, %c0_i32_0 : i32, i32
  }
}

module attributes {stable_mosaic.version = 11 : i64} {
  func.func @_encoder_classifier_kernel(%arg0: i32, %arg1: memref<1x8x1xi32, #tpu.memory_space<vmem>>, %arg2: memref<1x1x8xf32, #tpu.memory_space<vmem>>, %arg3: memref<128x32xf32, #tpu.memory_space<vmem>>, %arg4: memref<8x32xf32, #tpu.memory_space<vmem>>, %arg5: memref<1x32xf32, #tpu.memory_space<vmem>>, %arg6: memref<1x32xf32, #tpu.memory_space<vmem>>, %arg7: memref<1x32xf32, #tpu.memory_space<vmem>>, %arg8: memref<2x32x96xf32, #tpu.memory_space<vmem>>, %arg9: memref<2x1x96xf32, #tpu.memory_space<vmem>>, %arg10: memref<2x32x32xf32, #tpu.memory_space<vmem>>, %arg11: memref<2x1x32xf32, #tpu.memory_space<vmem>>, %arg12: memref<2x1x32xf32, #tpu.memory_space<vmem>>, %arg13: memref<2x1x32xf32, #tpu.memory_space<vmem>>, %arg14: memref<2x32x64xf32, #tpu.memory_space<vmem>>, %arg15: memref<2x1x64xf32, #tpu.memory_space<vmem>>, %arg16: memref<2x64x32xf32, #tpu.memory_space<vmem>>, %arg17: memref<2x1x32xf32, #tpu.memory_space<vmem>>, %arg18: memref<2x1x32xf32, #tpu.memory_space<vmem>>, %arg19: memref<2x1x32xf32, #tpu.memory_space<vmem>>, %arg20: memref<32x32xf32, #tpu.memory_space<vmem>>, %arg21: memref<1x32xf32, #tpu.memory_space<vmem>>, %arg22: memref<1x32x32xf32, #tpu.memory_space<vmem>>, %arg23: memref<1x1x32xf32, #tpu.memory_space<vmem>>, %arg24: memref<32x1xf32, #tpu.memory_space<vmem>>, %arg25: memref<1x1xf32, #tpu.memory_space<vmem>>, %arg26: memref<1x1x128xf32, #tpu.memory_space<vmem>>) attributes {dimension_semantics = [#tpu.dimension_semantics<parallel>], iteration_bounds = array<i64: 6>, scalar_prefetch = 0 : i64, scratch_operands = 0 : i64, tpu.core_type = #tpu.core_type<tc>, window_params = [{transform_indices = @transform_0, window_bounds = array<i64: 1, 8, 1>}, {transform_indices = @transform_1, window_bounds = array<i64: 1, 1, 8>}, {pipeline_mode = #tpu.pipeline_mode<synchronous>, transform_indices = @transform_2, window_bounds = array<i64: 128, 32>}, {pipeline_mode = #tpu.pipeline_mode<synchronous>, transform_indices = @transform_3, window_bounds = array<i64: 8, 32>}, {pipeline_mode = #tpu.pipeline_mode<synchronous>, transform_indices = @transform_4, window_bounds = array<i64: 1, 32>}, {pipeline_mode = #tpu.pipeline_mode<synchronous>, transform_indices = @transform_5, window_bounds = array<i64: 1, 32>}, {pipeline_mode = #tpu.pipeline_mode<synchronous>, transform_indices = @transform_6, window_bounds = array<i64: 1, 32>}, {pipeline_mode = #tpu.pipeline_mode<synchronous>, transform_indices = @transform_7, window_bounds = array<i64: 2, 32, 96>}, {pipeline_mode = #tpu.pipeline_mode<synchronous>, transform_indices = @transform_8, window_bounds = array<i64: 2, 1, 96>}, {pipeline_mode = #tpu.pipeline_mode<synchronous>, transform_indices = @transform_9, window_bounds = array<i64: 2, 32, 32>}, {pipeline_mode = #tpu.pipeline_mode<synchronous>, transform_indices = @transform_10, window_bounds = array<i64: 2, 1, 32>}, {pipeline_mode = #tpu.pipeline_mode<synchronous>, transform_indices = @transform_11, window_bounds = array<i64: 2, 1, 32>}, {pipeline_mode = #tpu.pipeline_mode<synchronous>, transform_indices = @transform_12, window_bounds = array<i64: 2, 1, 32>}, {pipeline_mode = #tpu.pipeline_mode<synchronous>, transform_indices = @transform_13, window_bounds = array<i64: 2, 32, 64>}, {pipeline_mode = #tpu.pipeline_mode<synchronous>, transform_indices = @transform_14, window_bounds = array<i64: 2, 1, 64>}, {pipeline_mode = #tpu.pipeline_mode<synchronous>, transform_indices = @transform_15, window_bounds = array<i64: 2, 64, 32>}, {pipeline_mode = #tpu.pipeline_mode<synchronous>, transform_indices = @transform_16, window_bounds = array<i64: 2, 1, 32>}, {pipeline_mode = #tpu.pipeline_mode<synchronous>, transform_indices = @transform_17, window_bounds = array<i64: 2, 1, 32>}, {pipeline_mode = #tpu.pipeline_mode<synchronous>, transform_indices = @transform_18, window_bounds = array<i64: 2, 1, 32>}, {pipeline_mode = #tpu.pipeline_mode<synchronous>, transform_indices = @transform_19, window_bounds = array<i64: 32, 32>}, {pipeline_mode = #tpu.pipeline_mode<synchronous>, transform_indices = @transform_20, window_bounds = array<i64: 1, 32>}, {pipeline_mode = #tpu.pipeline_mode<synchronous>, transform_indices = @transform_21, window_bounds = array<i64: 1, 32, 32>}, {pipeline_mode = #tpu.pipeline_mode<synchronous>, transform_indices = @transform_22, window_bounds = array<i64: 1, 1, 32>}, {pipeline_mode = #tpu.pipeline_mode<synchronous>, transform_indices = @transform_23, window_bounds = array<i64: 32, 1>}, {pipeline_mode = #tpu.pipeline_mode<synchronous>, transform_indices = @transform_24, window_bounds = array<i64: 1, 1>}, {transform_indices = @transform_25, window_bounds = array<i64: 1, 1, 128>}]} {
    %c0 = arith.constant 0 : index
    %c0_0 = arith.constant 0 : index
    %c0_1 = arith.constant 0 : index
    %0 = vector.load %arg1[%c0, %c0_0, %c0_1] : memref<1x8x1xi32, #tpu.memory_space<vmem>>, vector<1x8x1xi32>
    %1 = vector.shape_cast %0 : vector<1x8x1xi32> to vector<8x1xi32>
    %2 = tpu.iota {dimensions = array<i32: 1>} : vector<8x128xi32>
    %3 = vector.broadcast %1 : vector<8x1xi32> to vector<8x128xi32>
    %4 = arith.cmpi eq, %2, %3 : vector<8x128xi32>
    %5 = arith.extui %4 : vector<8x128xi1> to vector<8x128xi32>
    %6 = arith.sitofp %5 : vector<8x128xi32> to vector<8x128xf32>
    %c0_2 = arith.constant 0 : index
    %c0_3 = arith.constant 0 : index
    %7 = vector.load %arg3[%c0_2, %c0_3] : memref<128x32xf32, #tpu.memory_space<vmem>>, vector<128x32xf32>
    %cst = arith.constant dense<0.000000e+00> : vector<8x32xf32>
    %8 = tpu.matmul %6, %7, %cst {dimension_numbers = #tpu.dot_dimension_numbers<[1], [0], [0], [1], [0, 0, 1, 1], [], []>} : vector<8x128xf32>, vector<128x32xf32>, vector<8x32xf32> -> vector<8x32xf32>
    %c0_4 = arith.constant 0 : index
    %c0_5 = arith.constant 0 : index
    %9 = vector.load %arg4[%c0_4, %c0_5] : memref<8x32xf32, #tpu.memory_space<vmem>>, vector<8x32xf32>
    %10 = arith.addf %8, %9 : vector<8x32xf32>
    %c0_6 = arith.constant 0 : index
    %c0_7 = arith.constant 0 : index
    %11 = vector.load %arg5[%c0_6, %c0_7] : memref<1x32xf32, #tpu.memory_space<vmem>>, vector<1x32xf32>
    %12 = vector.broadcast %11 : vector<1x32xf32> to vector<8x32xf32>
    %13 = arith.addf %10, %12 : vector<8x32xf32>
    %c0_8 = arith.constant 0 : index
    %c0_9 = arith.constant 0 : index
    %14 = vector.load %arg6[%c0_8, %c0_9] : memref<1x32xf32, #tpu.memory_space<vmem>>, vector<1x32xf32>
    %c0_10 = arith.constant 0 : index
    %c0_11 = arith.constant 0 : index
    %15 = vector.load %arg7[%c0_10, %c0_11] : memref<1x32xf32, #tpu.memory_space<vmem>>, vector<1x32xf32>
    %cst_12 = arith.constant dense<0.000000e+00> : vector<8xf32>
    %16 = vector.multi_reduction <add>, %13, %cst_12 [1] : vector<8x32xf32> to vector<8xf32>
    %17 = vector.shape_cast %16 : vector<8xf32> to vector<8x1xf32>
    %cst_13 = arith.constant 3.200000e+01 : f32
    %18 = vector.broadcast %cst_13 : f32 to vector<8x1xf32>
    %19 = arith.divf %17, %18 : vector<8x1xf32>
    %20 = vector.broadcast %19 : vector<8x1xf32> to vector<8x32xf32>
    %21 = arith.subf %13, %20 : vector<8x32xf32>
    %22 = arith.mulf %21, %21 : vector<8x32xf32>
    %cst_14 = arith.constant dense<0.000000e+00> : vector<8xf32>
    %23 = vector.multi_reduction <add>, %22, %cst_14 [1] : vector<8x32xf32> to vector<8xf32>
    %24 = vector.shape_cast %23 : vector<8xf32> to vector<8x1xf32>
    %cst_15 = arith.constant 3.200000e+01 : f32
    %25 = vector.broadcast %cst_15 : f32 to vector<8x1xf32>
    %26 = arith.divf %24, %25 : vector<8x1xf32>
    %cst_16 = arith.constant 9.99999996E-13 : f32
    %27 = vector.broadcast %cst_16 : f32 to vector<8x1xf32>
    %28 = arith.addf %26, %27 : vector<8x1xf32>
    %29 = math.rsqrt %28 : vector<8x1xf32>
    %30 = vector.broadcast %29 : vector<8x1xf32> to vector<8x32xf32>
    %31 = arith.mulf %21, %30 : vector<8x32xf32>
    %32 = vector.broadcast %14 : vector<1x32xf32> to vector<8x32xf32>
    %33 = arith.mulf %31, %32 : vector<8x32xf32>
    %34 = vector.broadcast %15 : vector<1x32xf32> to vector<8x32xf32>
    %35 = arith.addf %33, %34 : vector<8x32xf32>
    %c0_17 = arith.constant 0 : index
    %c0_18 = arith.constant 0 : index
    %c0_19 = arith.constant 0 : index
    %36 = vector.load %arg2[%c0_17, %c0_18, %c0_19] : memref<1x1x8xf32, #tpu.memory_space<vmem>>, vector<1x1x8xf32>
    %37 = vector.shape_cast %36 : vector<1x1x8xf32> to vector<1x8xf32>
    %cst_20 = arith.constant 1.000000e+00 : f32
    %38 = vector.broadcast %cst_20 : f32 to vector<1x8xf32>
    %39 = arith.subf %38, %37 : vector<1x8xf32>
    %cst_21 = arith.constant -1.000000e+09 : f32
    %40 = vector.broadcast %cst_21 : f32 to vector<1x8xf32>
    %41 = arith.mulf %39, %40 : vector<1x8xf32>
    %c0_22 = arith.constant 0 : index
    %c0_23 = arith.constant 0 : index
    %c0_24 = arith.constant 0 : index
    %42 = vector.load %arg8[%c0_22, %c0_23, %c0_24] : memref<2x32x96xf32, #tpu.memory_space<vmem>>, vector<1x32x96xf32>
    %43 = vector.shape_cast %42 : vector<1x32x96xf32> to vector<32x96xf32>
    %cst_25 = arith.constant dense<0.000000e+00> : vector<8x96xf32>
    %44 = tpu.matmul %35, %43, %cst_25 {dimension_numbers = #tpu.dot_dimension_numbers<[1], [0], [0], [1], [0, 0, 1, 1], [], []>} : vector<8x32xf32>, vector<32x96xf32>, vector<8x96xf32> -> vector<8x96xf32>
    %c0_26 = arith.constant 0 : index
    %c0_27 = arith.constant 0 : index
    %c0_28 = arith.constant 0 : index
    %45 = vector.load %arg9[%c0_26, %c0_27, %c0_28] : memref<2x1x96xf32, #tpu.memory_space<vmem>>, vector<1x1x96xf32>
    %46 = vector.shape_cast %45 : vector<1x1x96xf32> to vector<1x96xf32>
    %47 = vector.broadcast %46 : vector<1x96xf32> to vector<8x96xf32>
    %48 = arith.addf %44, %47 : vector<8x96xf32>
    %49 = vector.extract_strided_slice %48 {offsets = [0, 0], sizes = [8, 16], strides = [1, 1]} : vector<8x96xf32> to vector<8x16xf32>
    %50 = vector.extract_strided_slice %48 {offsets = [0, 32], sizes = [8, 16], strides = [1, 1]} : vector<8x96xf32> to vector<8x16xf32>
    %51 = vector.extract_strided_slice %48 {offsets = [0, 64], sizes = [8, 16], strides = [1, 1]} : vector<8x96xf32> to vector<8x16xf32>
    %cst_29 = arith.constant dense<0.000000e+00> : vector<8x8xf32>
    %52 = tpu.matmul %49, %50, %cst_29 {dimension_numbers = #tpu.dot_dimension_numbers<[1], [1], [0], [0], [0, 0, 1, 0], [], []>} : vector<8x16xf32>, vector<8x16xf32>, vector<8x8xf32> -> vector<8x8xf32>
    %cst_30 = arith.constant 2.500000e-01 : f32
    %53 = vector.broadcast %cst_30 : f32 to vector<8x8xf32>
    %54 = arith.mulf %52, %53 : vector<8x8xf32>
    %55 = vector.broadcast %41 : vector<1x8xf32> to vector<8x8xf32>
    %56 = arith.addf %54, %55 : vector<8x8xf32>
    %cst_31 = arith.constant dense<0xFF800000> : vector<8xf32>
    %57 = vector.multi_reduction <maximumf>, %56, %cst_31 [1] : vector<8x8xf32> to vector<8xf32>
    %58 = vector.shape_cast %57 : vector<8xf32> to vector<8x1xf32>
    %59 = vector.broadcast %58 : vector<8x1xf32> to vector<8x8xf32>
    %60 = arith.subf %56, %59 : vector<8x8xf32>
    %61 = math.exp %60 : vector<8x8xf32>
    %cst_32 = arith.constant dense<0.000000e+00> : vector<8xf32>
    %62 = vector.multi_reduction <add>, %61, %cst_32 [1] : vector<8x8xf32> to vector<8xf32>
    %63 = vector.shape_cast %62 : vector<8xf32> to vector<8x1xf32>
    %64 = tpu.reciprocal %63 {approx = true} : vector<8x1xf32> -> vector<8x1xf32>
    %65 = vector.broadcast %64 : vector<8x1xf32> to vector<8x8xf32>
    %66 = arith.mulf %61, %65 : vector<8x8xf32>
    %cst_33 = arith.constant dense<0.000000e+00> : vector<8x16xf32>
    %67 = tpu.matmul %66, %51, %cst_33 {dimension_numbers = #tpu.dot_dimension_numbers<[1], [0], [0], [1], [0, 0, 1, 1], [], []>} : vector<8x8xf32>, vector<8x16xf32>, vector<8x16xf32> -> vector<8x16xf32>
    %68 = vector.extract_strided_slice %48 {offsets = [0, 16], sizes = [8, 16], strides = [1, 1]} : vector<8x96xf32> to vector<8x16xf32>
    %69 = vector.extract_strided_slice %48 {offsets = [0, 48], sizes = [8, 16], strides = [1, 1]} : vector<8x96xf32> to vector<8x16xf32>
    %70 = vector.extract_strided_slice %48 {offsets = [0, 80], sizes = [8, 16], strides = [1, 1]} : vector<8x96xf32> to vector<8x16xf32>
    %cst_34 = arith.constant dense<0.000000e+00> : vector<8x8xf32>
    %71 = tpu.matmul %68, %69, %cst_34 {dimension_numbers = #tpu.dot_dimension_numbers<[1], [1], [0], [0], [0, 0, 1, 0], [], []>} : vector<8x16xf32>, vector<8x16xf32>, vector<8x8xf32> -> vector<8x8xf32>
    %cst_35 = arith.constant 2.500000e-01 : f32
    %72 = vector.broadcast %cst_35 : f32 to vector<8x8xf32>
    %73 = arith.mulf %71, %72 : vector<8x8xf32>
    %74 = vector.broadcast %41 : vector<1x8xf32> to vector<8x8xf32>
    %75 = arith.addf %73, %74 : vector<8x8xf32>
    %cst_36 = arith.constant dense<0xFF800000> : vector<8xf32>
    %76 = vector.multi_reduction <maximumf>, %75, %cst_36 [1] : vector<8x8xf32> to vector<8xf32>
    %77 = vector.shape_cast %76 : vector<8xf32> to vector<8x1xf32>
    %78 = vector.broadcast %77 : vector<8x1xf32> to vector<8x8xf32>
    %79 = arith.subf %75, %78 : vector<8x8xf32>
    %80 = math.exp %79 : vector<8x8xf32>
    %cst_37 = arith.constant dense<0.000000e+00> : vector<8xf32>
    %81 = vector.multi_reduction <add>, %80, %cst_37 [1] : vector<8x8xf32> to vector<8xf32>
    %82 = vector.shape_cast %81 : vector<8xf32> to vector<8x1xf32>
    %83 = tpu.reciprocal %82 {approx = true} : vector<8x1xf32> -> vector<8x1xf32>
    %84 = vector.broadcast %83 : vector<8x1xf32> to vector<8x8xf32>
    %85 = arith.mulf %80, %84 : vector<8x8xf32>
    %cst_38 = arith.constant dense<0.000000e+00> : vector<8x16xf32>
    %86 = tpu.matmul %85, %70, %cst_38 {dimension_numbers = #tpu.dot_dimension_numbers<[1], [0], [0], [1], [0, 0, 1, 1], [], []>} : vector<8x8xf32>, vector<8x16xf32>, vector<8x16xf32> -> vector<8x16xf32>
    %87 = tpu.concatenate %67, %86 in 1 : vector<8x16xf32>, vector<8x16xf32> -> vector<8x32xf32>
    %c0_39 = arith.constant 0 : index
    %c0_40 = arith.constant 0 : index
    %c0_41 = arith.constant 0 : index
    %88 = vector.load %arg10[%c0_39, %c0_40, %c0_41] : memref<2x32x32xf32, #tpu.memory_space<vmem>>, vector<1x32x32xf32>
    %89 = vector.shape_cast %88 : vector<1x32x32xf32> to vector<32x32xf32>
    %cst_42 = arith.constant dense<0.000000e+00> : vector<8x32xf32>
    %90 = tpu.matmul %87, %89, %cst_42 {dimension_numbers = #tpu.dot_dimension_numbers<[1], [0], [0], [1], [0, 0, 1, 1], [], []>} : vector<8x32xf32>, vector<32x32xf32>, vector<8x32xf32> -> vector<8x32xf32>
    %c0_43 = arith.constant 0 : index
    %c0_44 = arith.constant 0 : index
    %c0_45 = arith.constant 0 : index
    %91 = vector.load %arg11[%c0_43, %c0_44, %c0_45] : memref<2x1x32xf32, #tpu.memory_space<vmem>>, vector<1x1x32xf32>
    %92 = vector.shape_cast %91 : vector<1x1x32xf32> to vector<1x32xf32>
    %93 = vector.broadcast %92 : vector<1x32xf32> to vector<8x32xf32>
    %94 = arith.addf %90, %93 : vector<8x32xf32>
    %95 = arith.addf %35, %94 : vector<8x32xf32>
    %c0_46 = arith.constant 0 : index
    %c0_47 = arith.constant 0 : index
    %c0_48 = arith.constant 0 : index
    %96 = vector.load %arg12[%c0_46, %c0_47, %c0_48] : memref<2x1x32xf32, #tpu.memory_space<vmem>>, vector<1x1x32xf32>
    %97 = vector.shape_cast %96 : vector<1x1x32xf32> to vector<1x32xf32>
    %c0_49 = arith.constant 0 : index
    %c0_50 = arith.constant 0 : index
    %c0_51 = arith.constant 0 : index
    %98 = vector.load %arg13[%c0_49, %c0_50, %c0_51] : memref<2x1x32xf32, #tpu.memory_space<vmem>>, vector<1x1x32xf32>
    %99 = vector.shape_cast %98 : vector<1x1x32xf32> to vector<1x32xf32>
    %cst_52 = arith.constant dense<0.000000e+00> : vector<8xf32>
    %100 = vector.multi_reduction <add>, %95, %cst_52 [1] : vector<8x32xf32> to vector<8xf32>
    %101 = vector.shape_cast %100 : vector<8xf32> to vector<8x1xf32>
    %cst_53 = arith.constant 3.200000e+01 : f32
    %102 = vector.broadcast %cst_53 : f32 to vector<8x1xf32>
    %103 = arith.divf %101, %102 : vector<8x1xf32>
    %104 = vector.broadcast %103 : vector<8x1xf32> to vector<8x32xf32>
    %105 = arith.subf %95, %104 : vector<8x32xf32>
    %106 = arith.mulf %105, %105 : vector<8x32xf32>
    %cst_54 = arith.constant dense<0.000000e+00> : vector<8xf32>
    %107 = vector.multi_reduction <add>, %106, %cst_54 [1] : vector<8x32xf32> to vector<8xf32>
    %108 = vector.shape_cast %107 : vector<8xf32> to vector<8x1xf32>
    %cst_55 = arith.constant 3.200000e+01 : f32
    %109 = vector.broadcast %cst_55 : f32 to vector<8x1xf32>
    %110 = arith.divf %108, %109 : vector<8x1xf32>
    %cst_56 = arith.constant 9.99999996E-13 : f32
    %111 = vector.broadcast %cst_56 : f32 to vector<8x1xf32>
    %112 = arith.addf %110, %111 : vector<8x1xf32>
    %113 = math.rsqrt %112 : vector<8x1xf32>
    %114 = vector.broadcast %113 : vector<8x1xf32> to vector<8x32xf32>
    %115 = arith.mulf %105, %114 : vector<8x32xf32>
    %116 = vector.broadcast %97 : vector<1x32xf32> to vector<8x32xf32>
    %117 = arith.mulf %115, %116 : vector<8x32xf32>
    %118 = vector.broadcast %99 : vector<1x32xf32> to vector<8x32xf32>
    %119 = arith.addf %117, %118 : vector<8x32xf32>
    %c0_57 = arith.constant 0 : index
    %c0_58 = arith.constant 0 : index
    %c0_59 = arith.constant 0 : index
    %120 = vector.load %arg14[%c0_57, %c0_58, %c0_59] : memref<2x32x64xf32, #tpu.memory_space<vmem>>, vector<1x32x64xf32>
    %121 = vector.shape_cast %120 : vector<1x32x64xf32> to vector<32x64xf32>
    %cst_60 = arith.constant dense<0.000000e+00> : vector<8x64xf32>
    %122 = tpu.matmul %119, %121, %cst_60 {dimension_numbers = #tpu.dot_dimension_numbers<[1], [0], [0], [1], [0, 0, 1, 1], [], []>} : vector<8x32xf32>, vector<32x64xf32>, vector<8x64xf32> -> vector<8x64xf32>
    %c0_61 = arith.constant 0 : index
    %c0_62 = arith.constant 0 : index
    %c0_63 = arith.constant 0 : index
    %123 = vector.load %arg15[%c0_61, %c0_62, %c0_63] : memref<2x1x64xf32, #tpu.memory_space<vmem>>, vector<1x1x64xf32>
    %124 = vector.shape_cast %123 : vector<1x1x64xf32> to vector<1x64xf32>
    %125 = vector.broadcast %124 : vector<1x64xf32> to vector<8x64xf32>
    %126 = arith.addf %122, %125 : vector<8x64xf32>
    %127 = arith.mulf %126, %126 : vector<8x64xf32>
    %128 = arith.mulf %126, %127 : vector<8x64xf32>
    %cst_64 = arith.constant 4.471500e-02 : f32
    %129 = vector.broadcast %cst_64 : f32 to vector<8x64xf32>
    %130 = arith.mulf %129, %128 : vector<8x64xf32>
    %131 = arith.addf %126, %130 : vector<8x64xf32>
    %cst_65 = arith.constant 0.797884583 : f32
    %132 = vector.broadcast %cst_65 : f32 to vector<8x64xf32>
    %133 = arith.mulf %132, %131 : vector<8x64xf32>
    %134 = math.tanh %133 : vector<8x64xf32>
    %cst_66 = arith.constant 1.000000e+00 : f32
    %135 = vector.broadcast %cst_66 : f32 to vector<8x64xf32>
    %136 = arith.addf %135, %134 : vector<8x64xf32>
    %cst_67 = arith.constant 5.000000e-01 : f32
    %137 = vector.broadcast %cst_67 : f32 to vector<8x64xf32>
    %138 = arith.mulf %137, %136 : vector<8x64xf32>
    %139 = arith.mulf %126, %138 : vector<8x64xf32>
    %c0_68 = arith.constant 0 : index
    %c0_69 = arith.constant 0 : index
    %c0_70 = arith.constant 0 : index
    %140 = vector.load %arg16[%c0_68, %c0_69, %c0_70] : memref<2x64x32xf32, #tpu.memory_space<vmem>>, vector<1x64x32xf32>
    %141 = vector.shape_cast %140 : vector<1x64x32xf32> to vector<64x32xf32>
    %cst_71 = arith.constant dense<0.000000e+00> : vector<8x32xf32>
    %142 = tpu.matmul %139, %141, %cst_71 {dimension_numbers = #tpu.dot_dimension_numbers<[1], [0], [0], [1], [0, 0, 1, 1], [], []>} : vector<8x64xf32>, vector<64x32xf32>, vector<8x32xf32> -> vector<8x32xf32>
    %c0_72 = arith.constant 0 : index
    %c0_73 = arith.constant 0 : index
    %c0_74 = arith.constant 0 : index
    %143 = vector.load %arg17[%c0_72, %c0_73, %c0_74] : memref<2x1x32xf32, #tpu.memory_space<vmem>>, vector<1x1x32xf32>
    %144 = vector.shape_cast %143 : vector<1x1x32xf32> to vector<1x32xf32>
    %145 = vector.broadcast %144 : vector<1x32xf32> to vector<8x32xf32>
    %146 = arith.addf %142, %145 : vector<8x32xf32>
    %147 = arith.addf %119, %146 : vector<8x32xf32>
    %c0_75 = arith.constant 0 : index
    %c0_76 = arith.constant 0 : index
    %c0_77 = arith.constant 0 : index
    %148 = vector.load %arg18[%c0_75, %c0_76, %c0_77] : memref<2x1x32xf32, #tpu.memory_space<vmem>>, vector<1x1x32xf32>
    %149 = vector.shape_cast %148 : vector<1x1x32xf32> to vector<1x32xf32>
    %c0_78 = arith.constant 0 : index
    %c0_79 = arith.constant 0 : index
    %c0_80 = arith.constant 0 : index
    %150 = vector.load %arg19[%c0_78, %c0_79, %c0_80] : memref<2x1x32xf32, #tpu.memory_space<vmem>>, vector<1x1x32xf32>
    %151 = vector.shape_cast %150 : vector<1x1x32xf32> to vector<1x32xf32>
    %cst_81 = arith.constant dense<0.000000e+00> : vector<8xf32>
    %152 = vector.multi_reduction <add>, %147, %cst_81 [1] : vector<8x32xf32> to vector<8xf32>
    %153 = vector.shape_cast %152 : vector<8xf32> to vector<8x1xf32>
    %cst_82 = arith.constant 3.200000e+01 : f32
    %154 = vector.broadcast %cst_82 : f32 to vector<8x1xf32>
    %155 = arith.divf %153, %154 : vector<8x1xf32>
    %156 = vector.broadcast %155 : vector<8x1xf32> to vector<8x32xf32>
    %157 = arith.subf %147, %156 : vector<8x32xf32>
    %158 = arith.mulf %157, %157 : vector<8x32xf32>
    %cst_83 = arith.constant dense<0.000000e+00> : vector<8xf32>
    %159 = vector.multi_reduction <add>, %158, %cst_83 [1] : vector<8x32xf32> to vector<8xf32>
    %160 = vector.shape_cast %159 : vector<8xf32> to vector<8x1xf32>
    %cst_84 = arith.constant 3.200000e+01 : f32
    %161 = vector.broadcast %cst_84 : f32 to vector<8x1xf32>
    %162 = arith.divf %160, %161 : vector<8x1xf32>
    %cst_85 = arith.constant 9.99999996E-13 : f32
    %163 = vector.broadcast %cst_85 : f32 to vector<8x1xf32>
    %164 = arith.addf %162, %163 : vector<8x1xf32>
    %165 = math.rsqrt %164 : vector<8x1xf32>
    %166 = vector.broadcast %165 : vector<8x1xf32> to vector<8x32xf32>
    %167 = arith.mulf %157, %166 : vector<8x32xf32>
    %168 = vector.broadcast %149 : vector<1x32xf32> to vector<8x32xf32>
    %169 = arith.mulf %167, %168 : vector<8x32xf32>
    %170 = vector.broadcast %151 : vector<1x32xf32> to vector<8x32xf32>
    %171 = arith.addf %169, %170 : vector<8x32xf32>
    %c1 = arith.constant 1 : index
    %c0_86 = arith.constant 0 : index
    %c0_87 = arith.constant 0 : index
    %172 = vector.load %arg8[%c1, %c0_86, %c0_87] : memref<2x32x96xf32, #tpu.memory_space<vmem>>, vector<1x32x96xf32>
    %173 = vector.shape_cast %172 : vector<1x32x96xf32> to vector<32x96xf32>
    %cst_88 = arith.constant dense<0.000000e+00> : vector<8x96xf32>
    %174 = tpu.matmul %171, %173, %cst_88 {dimension_numbers = #tpu.dot_dimension_numbers<[1], [0], [0], [1], [0, 0, 1, 1], [], []>} : vector<8x32xf32>, vector<32x96xf32>, vector<8x96xf32> -> vector<8x96xf32>
    %c1_89 = arith.constant 1 : index
    %c0_90 = arith.constant 0 : index
    %c0_91 = arith.constant 0 : index
    %175 = vector.load %arg9[%c1_89, %c0_90, %c0_91] : memref<2x1x96xf32, #tpu.memory_space<vmem>>, vector<1x1x96xf32>
    %176 = vector.shape_cast %175 : vector<1x1x96xf32> to vector<1x96xf32>
    %177 = vector.broadcast %176 : vector<1x96xf32> to vector<8x96xf32>
    %178 = arith.addf %174, %177 : vector<8x96xf32>
    %179 = vector.extract_strided_slice %178 {offsets = [0, 0], sizes = [8, 16], strides = [1, 1]} : vector<8x96xf32> to vector<8x16xf32>
    %180 = vector.extract_strided_slice %178 {offsets = [0, 32], sizes = [8, 16], strides = [1, 1]} : vector<8x96xf32> to vector<8x16xf32>
    %181 = vector.extract_strided_slice %178 {offsets = [0, 64], sizes = [8, 16], strides = [1, 1]} : vector<8x96xf32> to vector<8x16xf32>
    %cst_92 = arith.constant dense<0.000000e+00> : vector<8x8xf32>
    %182 = tpu.matmul %179, %180, %cst_92 {dimension_numbers = #tpu.dot_dimension_numbers<[1], [1], [0], [0], [0, 0, 1, 0], [], []>} : vector<8x16xf32>, vector<8x16xf32>, vector<8x8xf32> -> vector<8x8xf32>
    %cst_93 = arith.constant 2.500000e-01 : f32
    %183 = vector.broadcast %cst_93 : f32 to vector<8x8xf32>
    %184 = arith.mulf %182, %183 : vector<8x8xf32>
    %185 = vector.broadcast %41 : vector<1x8xf32> to vector<8x8xf32>
    %186 = arith.addf %184, %185 : vector<8x8xf32>
    %cst_94 = arith.constant dense<0xFF800000> : vector<8xf32>
    %187 = vector.multi_reduction <maximumf>, %186, %cst_94 [1] : vector<8x8xf32> to vector<8xf32>
    %188 = vector.shape_cast %187 : vector<8xf32> to vector<8x1xf32>
    %189 = vector.broadcast %188 : vector<8x1xf32> to vector<8x8xf32>
    %190 = arith.subf %186, %189 : vector<8x8xf32>
    %191 = math.exp %190 : vector<8x8xf32>
    %cst_95 = arith.constant dense<0.000000e+00> : vector<8xf32>
    %192 = vector.multi_reduction <add>, %191, %cst_95 [1] : vector<8x8xf32> to vector<8xf32>
    %193 = vector.shape_cast %192 : vector<8xf32> to vector<8x1xf32>
    %194 = tpu.reciprocal %193 {approx = true} : vector<8x1xf32> -> vector<8x1xf32>
    %195 = vector.broadcast %194 : vector<8x1xf32> to vector<8x8xf32>
    %196 = arith.mulf %191, %195 : vector<8x8xf32>
    %cst_96 = arith.constant dense<0.000000e+00> : vector<8x16xf32>
    %197 = tpu.matmul %196, %181, %cst_96 {dimension_numbers = #tpu.dot_dimension_numbers<[1], [0], [0], [1], [0, 0, 1, 1], [], []>} : vector<8x8xf32>, vector<8x16xf32>, vector<8x16xf32> -> vector<8x16xf32>
    %198 = vector.extract_strided_slice %178 {offsets = [0, 16], sizes = [8, 16], strides = [1, 1]} : vector<8x96xf32> to vector<8x16xf32>
    %199 = vector.extract_strided_slice %178 {offsets = [0, 48], sizes = [8, 16], strides = [1, 1]} : vector<8x96xf32> to vector<8x16xf32>
    %200 = vector.extract_strided_slice %178 {offsets = [0, 80], sizes = [8, 16], strides = [1, 1]} : vector<8x96xf32> to vector<8x16xf32>
    %cst_97 = arith.constant dense<0.000000e+00> : vector<8x8xf32>
    %201 = tpu.matmul %198, %199, %cst_97 {dimension_numbers = #tpu.dot_dimension_numbers<[1], [1], [0], [0], [0, 0, 1, 0], [], []>} : vector<8x16xf32>, vector<8x16xf32>, vector<8x8xf32> -> vector<8x8xf32>
    %cst_98 = arith.constant 2.500000e-01 : f32
    %202 = vector.broadcast %cst_98 : f32 to vector<8x8xf32>
    %203 = arith.mulf %201, %202 : vector<8x8xf32>
    %204 = vector.broadcast %41 : vector<1x8xf32> to vector<8x8xf32>
    %205 = arith.addf %203, %204 : vector<8x8xf32>
    %cst_99 = arith.constant dense<0xFF800000> : vector<8xf32>
    %206 = vector.multi_reduction <maximumf>, %205, %cst_99 [1] : vector<8x8xf32> to vector<8xf32>
    %207 = vector.shape_cast %206 : vector<8xf32> to vector<8x1xf32>
    %208 = vector.broadcast %207 : vector<8x1xf32> to vector<8x8xf32>
    %209 = arith.subf %205, %208 : vector<8x8xf32>
    %210 = math.exp %209 : vector<8x8xf32>
    %cst_100 = arith.constant dense<0.000000e+00> : vector<8xf32>
    %211 = vector.multi_reduction <add>, %210, %cst_100 [1] : vector<8x8xf32> to vector<8xf32>
    %212 = vector.shape_cast %211 : vector<8xf32> to vector<8x1xf32>
    %213 = tpu.reciprocal %212 {approx = true} : vector<8x1xf32> -> vector<8x1xf32>
    %214 = vector.broadcast %213 : vector<8x1xf32> to vector<8x8xf32>
    %215 = arith.mulf %210, %214 : vector<8x8xf32>
    %cst_101 = arith.constant dense<0.000000e+00> : vector<8x16xf32>
    %216 = tpu.matmul %215, %200, %cst_101 {dimension_numbers = #tpu.dot_dimension_numbers<[1], [0], [0], [1], [0, 0, 1, 1], [], []>} : vector<8x8xf32>, vector<8x16xf32>, vector<8x16xf32> -> vector<8x16xf32>
    %217 = tpu.concatenate %197, %216 in 1 : vector<8x16xf32>, vector<8x16xf32> -> vector<8x32xf32>
    %c1_102 = arith.constant 1 : index
    %c0_103 = arith.constant 0 : index
    %c0_104 = arith.constant 0 : index
    %218 = vector.load %arg10[%c1_102, %c0_103, %c0_104] : memref<2x32x32xf32, #tpu.memory_space<vmem>>, vector<1x32x32xf32>
    %219 = vector.shape_cast %218 : vector<1x32x32xf32> to vector<32x32xf32>
    %cst_105 = arith.constant dense<0.000000e+00> : vector<8x32xf32>
    %220 = tpu.matmul %217, %219, %cst_105 {dimension_numbers = #tpu.dot_dimension_numbers<[1], [0], [0], [1], [0, 0, 1, 1], [], []>} : vector<8x32xf32>, vector<32x32xf32>, vector<8x32xf32> -> vector<8x32xf32>
    %c1_106 = arith.constant 1 : index
    %c0_107 = arith.constant 0 : index
    %c0_108 = arith.constant 0 : index
    %221 = vector.load %arg11[%c1_106, %c0_107, %c0_108] : memref<2x1x32xf32, #tpu.memory_space<vmem>>, vector<1x1x32xf32>
    %222 = vector.shape_cast %221 : vector<1x1x32xf32> to vector<1x32xf32>
    %223 = vector.broadcast %222 : vector<1x32xf32> to vector<8x32xf32>
    %224 = arith.addf %220, %223 : vector<8x32xf32>
    %225 = arith.addf %171, %224 : vector<8x32xf32>
    %c1_109 = arith.constant 1 : index
    %c0_110 = arith.constant 0 : index
    %c0_111 = arith.constant 0 : index
    %226 = vector.load %arg12[%c1_109, %c0_110, %c0_111] : memref<2x1x32xf32, #tpu.memory_space<vmem>>, vector<1x1x32xf32>
    %227 = vector.shape_cast %226 : vector<1x1x32xf32> to vector<1x32xf32>
    %c1_112 = arith.constant 1 : index
    %c0_113 = arith.constant 0 : index
    %c0_114 = arith.constant 0 : index
    %228 = vector.load %arg13[%c1_112, %c0_113, %c0_114] : memref<2x1x32xf32, #tpu.memory_space<vmem>>, vector<1x1x32xf32>
    %229 = vector.shape_cast %228 : vector<1x1x32xf32> to vector<1x32xf32>
    %cst_115 = arith.constant dense<0.000000e+00> : vector<8xf32>
    %230 = vector.multi_reduction <add>, %225, %cst_115 [1] : vector<8x32xf32> to vector<8xf32>
    %231 = vector.shape_cast %230 : vector<8xf32> to vector<8x1xf32>
    %cst_116 = arith.constant 3.200000e+01 : f32
    %232 = vector.broadcast %cst_116 : f32 to vector<8x1xf32>
    %233 = arith.divf %231, %232 : vector<8x1xf32>
    %234 = vector.broadcast %233 : vector<8x1xf32> to vector<8x32xf32>
    %235 = arith.subf %225, %234 : vector<8x32xf32>
    %236 = arith.mulf %235, %235 : vector<8x32xf32>
    %cst_117 = arith.constant dense<0.000000e+00> : vector<8xf32>
    %237 = vector.multi_reduction <add>, %236, %cst_117 [1] : vector<8x32xf32> to vector<8xf32>
    %238 = vector.shape_cast %237 : vector<8xf32> to vector<8x1xf32>
    %cst_118 = arith.constant 3.200000e+01 : f32
    %239 = vector.broadcast %cst_118 : f32 to vector<8x1xf32>
    %240 = arith.divf %238, %239 : vector<8x1xf32>
    %cst_119 = arith.constant 9.99999996E-13 : f32
    %241 = vector.broadcast %cst_119 : f32 to vector<8x1xf32>
    %242 = arith.addf %240, %241 : vector<8x1xf32>
    %243 = math.rsqrt %242 : vector<8x1xf32>
    %244 = vector.broadcast %243 : vector<8x1xf32> to vector<8x32xf32>
    %245 = arith.mulf %235, %244 : vector<8x32xf32>
    %246 = vector.broadcast %227 : vector<1x32xf32> to vector<8x32xf32>
    %247 = arith.mulf %245, %246 : vector<8x32xf32>
    %248 = vector.broadcast %229 : vector<1x32xf32> to vector<8x32xf32>
    %249 = arith.addf %247, %248 : vector<8x32xf32>
    %c1_120 = arith.constant 1 : index
    %c0_121 = arith.constant 0 : index
    %c0_122 = arith.constant 0 : index
    %250 = vector.load %arg14[%c1_120, %c0_121, %c0_122] : memref<2x32x64xf32, #tpu.memory_space<vmem>>, vector<1x32x64xf32>
    %251 = vector.shape_cast %250 : vector<1x32x64xf32> to vector<32x64xf32>
    %cst_123 = arith.constant dense<0.000000e+00> : vector<8x64xf32>
    %252 = tpu.matmul %249, %251, %cst_123 {dimension_numbers = #tpu.dot_dimension_numbers<[1], [0], [0], [1], [0, 0, 1, 1], [], []>} : vector<8x32xf32>, vector<32x64xf32>, vector<8x64xf32> -> vector<8x64xf32>
    %c1_124 = arith.constant 1 : index
    %c0_125 = arith.constant 0 : index
    %c0_126 = arith.constant 0 : index
    %253 = vector.load %arg15[%c1_124, %c0_125, %c0_126] : memref<2x1x64xf32, #tpu.memory_space<vmem>>, vector<1x1x64xf32>
    %254 = vector.shape_cast %253 : vector<1x1x64xf32> to vector<1x64xf32>
    %255 = vector.broadcast %254 : vector<1x64xf32> to vector<8x64xf32>
    %256 = arith.addf %252, %255 : vector<8x64xf32>
    %257 = arith.mulf %256, %256 : vector<8x64xf32>
    %258 = arith.mulf %256, %257 : vector<8x64xf32>
    %cst_127 = arith.constant 4.471500e-02 : f32
    %259 = vector.broadcast %cst_127 : f32 to vector<8x64xf32>
    %260 = arith.mulf %259, %258 : vector<8x64xf32>
    %261 = arith.addf %256, %260 : vector<8x64xf32>
    %cst_128 = arith.constant 0.797884583 : f32
    %262 = vector.broadcast %cst_128 : f32 to vector<8x64xf32>
    %263 = arith.mulf %262, %261 : vector<8x64xf32>
    %264 = math.tanh %263 : vector<8x64xf32>
    %cst_129 = arith.constant 1.000000e+00 : f32
    %265 = vector.broadcast %cst_129 : f32 to vector<8x64xf32>
    %266 = arith.addf %265, %264 : vector<8x64xf32>
    %cst_130 = arith.constant 5.000000e-01 : f32
    %267 = vector.broadcast %cst_130 : f32 to vector<8x64xf32>
    %268 = arith.mulf %267, %266 : vector<8x64xf32>
    %269 = arith.mulf %256, %268 : vector<8x64xf32>
    %c1_131 = arith.constant 1 : index
    %c0_132 = arith.constant 0 : index
    %c0_133 = arith.constant 0 : index
    %270 = vector.load %arg16[%c1_131, %c0_132, %c0_133] : memref<2x64x32xf32, #tpu.memory_space<vmem>>, vector<1x64x32xf32>
    %271 = vector.shape_cast %270 : vector<1x64x32xf32> to vector<64x32xf32>
    %cst_134 = arith.constant dense<0.000000e+00> : vector<8x32xf32>
    %272 = tpu.matmul %269, %271, %cst_134 {dimension_numbers = #tpu.dot_dimension_numbers<[1], [0], [0], [1], [0, 0, 1, 1], [], []>} : vector<8x64xf32>, vector<64x32xf32>, vector<8x32xf32> -> vector<8x32xf32>
    %c1_135 = arith.constant 1 : index
    %c0_136 = arith.constant 0 : index
    %c0_137 = arith.constant 0 : index
    %273 = vector.load %arg17[%c1_135, %c0_136, %c0_137] : memref<2x1x32xf32, #tpu.memory_space<vmem>>, vector<1x1x32xf32>
    %274 = vector.shape_cast %273 : vector<1x1x32xf32> to vector<1x32xf32>
    %275 = vector.broadcast %274 : vector<1x32xf32> to vector<8x32xf32>
    %276 = arith.addf %272, %275 : vector<8x32xf32>
    %277 = arith.addf %249, %276 : vector<8x32xf32>
    %c1_138 = arith.constant 1 : index
    %c0_139 = arith.constant 0 : index
    %c0_140 = arith.constant 0 : index
    %278 = vector.load %arg18[%c1_138, %c0_139, %c0_140] : memref<2x1x32xf32, #tpu.memory_space<vmem>>, vector<1x1x32xf32>
    %279 = vector.shape_cast %278 : vector<1x1x32xf32> to vector<1x32xf32>
    %c1_141 = arith.constant 1 : index
    %c0_142 = arith.constant 0 : index
    %c0_143 = arith.constant 0 : index
    %280 = vector.load %arg19[%c1_141, %c0_142, %c0_143] : memref<2x1x32xf32, #tpu.memory_space<vmem>>, vector<1x1x32xf32>
    %281 = vector.shape_cast %280 : vector<1x1x32xf32> to vector<1x32xf32>
    %cst_144 = arith.constant dense<0.000000e+00> : vector<8xf32>
    %282 = vector.multi_reduction <add>, %277, %cst_144 [1] : vector<8x32xf32> to vector<8xf32>
    %283 = vector.shape_cast %282 : vector<8xf32> to vector<8x1xf32>
    %cst_145 = arith.constant 3.200000e+01 : f32
    %284 = vector.broadcast %cst_145 : f32 to vector<8x1xf32>
    %285 = arith.divf %283, %284 : vector<8x1xf32>
    %286 = vector.broadcast %285 : vector<8x1xf32> to vector<8x32xf32>
    %287 = arith.subf %277, %286 : vector<8x32xf32>
    %288 = arith.mulf %287, %287 : vector<8x32xf32>
    %cst_146 = arith.constant dense<0.000000e+00> : vector<8xf32>
    %289 = vector.multi_reduction <add>, %288, %cst_146 [1] : vector<8x32xf32> to vector<8xf32>
    %290 = vector.shape_cast %289 : vector<8xf32> to vector<8x1xf32>
    %cst_147 = arith.constant 3.200000e+01 : f32
    %291 = vector.broadcast %cst_147 : f32 to vector<8x1xf32>
    %292 = arith.divf %290, %291 : vector<8x1xf32>
    %cst_148 = arith.constant 9.99999996E-13 : f32
    %293 = vector.broadcast %cst_148 : f32 to vector<8x1xf32>
    %294 = arith.addf %292, %293 : vector<8x1xf32>
    %295 = math.rsqrt %294 : vector<8x1xf32>
    %296 = vector.broadcast %295 : vector<8x1xf32> to vector<8x32xf32>
    %297 = arith.mulf %287, %296 : vector<8x32xf32>
    %298 = vector.broadcast %279 : vector<1x32xf32> to vector<8x32xf32>
    %299 = arith.mulf %297, %298 : vector<8x32xf32>
    %300 = vector.broadcast %281 : vector<1x32xf32> to vector<8x32xf32>
    %301 = arith.addf %299, %300 : vector<8x32xf32>
    %302 = vector.extract_strided_slice %301 {offsets = [0, 0], sizes = [1, 32], strides = [1, 1]} : vector<8x32xf32> to vector<1x32xf32>
    %c0_149 = arith.constant 0 : index
    %c0_150 = arith.constant 0 : index
    %303 = vector.load %arg20[%c0_149, %c0_150] : memref<32x32xf32, #tpu.memory_space<vmem>>, vector<32x32xf32>
    %cst_151 = arith.constant dense<0.000000e+00> : vector<1x32xf32>
    %304 = tpu.matmul %302, %303, %cst_151 {dimension_numbers = #tpu.dot_dimension_numbers<[1], [0], [0], [1], [0, 0, 1, 1], [], []>} : vector<1x32xf32>, vector<32x32xf32>, vector<1x32xf32> -> vector<1x32xf32>
    %c0_152 = arith.constant 0 : index
    %c0_153 = arith.constant 0 : index
    %305 = vector.load %arg21[%c0_152, %c0_153] : memref<1x32xf32, #tpu.memory_space<vmem>>, vector<1x32xf32>
    %306 = arith.addf %304, %305 : vector<1x32xf32>
    %c0_154 = arith.constant 0 : index
    %c0_155 = arith.constant 0 : index
    %c0_156 = arith.constant 0 : index
    %307 = vector.load %arg22[%c0_154, %c0_155, %c0_156] : memref<1x32x32xf32, #tpu.memory_space<vmem>>, vector<1x32x32xf32>
    %308 = vector.shape_cast %307 : vector<1x32x32xf32> to vector<32x32xf32>
    %cst_157 = arith.constant dense<0.000000e+00> : vector<1x32xf32>
    %309 = tpu.matmul %306, %308, %cst_157 {dimension_numbers = #tpu.dot_dimension_numbers<[1], [0], [0], [1], [0, 0, 1, 1], [], []>} : vector<1x32xf32>, vector<32x32xf32>, vector<1x32xf32> -> vector<1x32xf32>
    %c0_158 = arith.constant 0 : index
    %c0_159 = arith.constant 0 : index
    %c0_160 = arith.constant 0 : index
    %310 = vector.load %arg23[%c0_158, %c0_159, %c0_160] : memref<1x1x32xf32, #tpu.memory_space<vmem>>, vector<1x1x32xf32>
    %311 = vector.shape_cast %310 : vector<1x1x32xf32> to vector<1x32xf32>
    %312 = arith.addf %309, %311 : vector<1x32xf32>
    %cst_161 = arith.constant 0.000000e+00 : f32
    %313 = vector.broadcast %cst_161 : f32 to vector<1x32xf32>
    %314 = arith.maximumf %312, %313 : vector<1x32xf32>
    %c0_162 = arith.constant 0 : index
    %c0_163 = arith.constant 0 : index
    %315 = vector.load %arg24[%c0_162, %c0_163] : memref<32x1xf32, #tpu.memory_space<vmem>>, vector<32x1xf32>
    %cst_164 = arith.constant dense<0.000000e+00> : vector<1x1xf32>
    %316 = tpu.matmul %314, %315, %cst_164 {dimension_numbers = #tpu.dot_dimension_numbers<[1], [0], [0], [1], [0, 0, 1, 1], [], []>} : vector<1x32xf32>, vector<32x1xf32>, vector<1x1xf32> -> vector<1x1xf32>
    %c0_165 = arith.constant 0 : index
    %c0_166 = arith.constant 0 : index
    %317 = vector.load %arg25[%c0_165, %c0_166] : memref<1x1xf32, #tpu.memory_space<vmem>>, vector<1x1xf32>
    %318 = arith.addf %316, %317 : vector<1x1xf32>
    %319 = vector.shape_cast %318 : vector<1x1xf32> to vector<1x1x1xf32>
    %320 = vector.broadcast %319 : vector<1x1x1xf32> to vector<1x1x128xf32>
    %c0_167 = arith.constant 0 : index
    %c0_168 = arith.constant 0 : index
    %c0_169 = arith.constant 0 : index
    %321 = vector.load %arg26[%c0_167, %c0_168, %c0_169] : memref<1x1x128xf32, #tpu.memory_space<vmem>>, vector<1x1x128xf32>
    tpu.vector_store %arg26[%c0_167, %c0_168, %c0_169], %320 {strides = array<i32>} : memref<1x1x128xf32, #tpu.memory_space<vmem>>, vector<1x1x128xf32>,
    return
  }
  func.func @transform_0(%arg0: i32) -> (i32, i32, i32) {
    %c0_i32 = arith.constant 0 : i32
    %c0_i32_0 = arith.constant 0 : i32
    %c0_i32_1 = arith.constant 0 : i32
    return %arg0, %c0_i32, %c0_i32_0 : i32, i32, i32
  }
  func.func @transform_1(%arg0: i32) -> (i32, i32, i32) {
    %c0_i32 = arith.constant 0 : i32
    %c0_i32_0 = arith.constant 0 : i32
    %c0_i32_1 = arith.constant 0 : i32
    return %arg0, %c0_i32, %c0_i32_0 : i32, i32, i32
  }
  func.func @transform_2(%arg0: i32) -> (i32, i32) {
    %c0_i32 = arith.constant 0 : i32
    %c0_i32_0 = arith.constant 0 : i32
    %c0_i32_1 = arith.constant 0 : i32
    return %c0_i32, %c0_i32_0 : i32, i32
  }
  func.func @transform_3(%arg0: i32) -> (i32, i32) {
    %c0_i32 = arith.constant 0 : i32
    %c0_i32_0 = arith.constant 0 : i32
    %c0_i32_1 = arith.constant 0 : i32
    return %c0_i32, %c0_i32_0 : i32, i32
  }
  func.func @transform_4(%arg0: i32) -> (i32, i32) {
    %c0_i32 = arith.constant 0 : i32
    %c0_i32_0 = arith.constant 0 : i32
    %c0_i32_1 = arith.constant 0 : i32
    return %c0_i32, %c0_i32_0 : i32, i32
  }
  func.func @transform_5(%arg0: i32) -> (i32, i32) {
    %c0_i32 = arith.constant 0 : i32
    %c0_i32_0 = arith.constant 0 : i32
    %c0_i32_1 = arith.constant 0 : i32
    return %c0_i32, %c0_i32_0 : i32, i32
  }
  func.func @transform_6(%arg0: i32) -> (i32, i32) {
    %c0_i32 = arith.constant 0 : i32
    %c0_i32_0 = arith.constant 0 : i32
    %c0_i32_1 = arith.constant 0 : i32
    return %c0_i32, %c0_i32_0 : i32, i32
  }
  func.func @transform_7(%arg0: i32) -> (i32, i32, i32) {
    %c0_i32 = arith.constant 0 : i32
    %c0_i32_0 = arith.constant 0 : i32
    %c0_i32_1 = arith.constant 0 : i32
    %c0_i32_2 = arith.constant 0 : i32
    return %c0_i32, %c0_i32_0, %c0_i32_1 : i32, i32, i32
  }
  func.func @transform_8(%arg0: i32) -> (i32, i32, i32) {
    %c0_i32 = arith.constant 0 : i32
    %c0_i32_0 = arith.constant 0 : i32
    %c0_i32_1 = arith.constant 0 : i32
    %c0_i32_2 = arith.constant 0 : i32
    return %c0_i32, %c0_i32_0, %c0_i32_1 : i32, i32, i32
  }
  func.func @transform_9(%arg0: i32) -> (i32, i32, i32) {
    %c0_i32 = arith.constant 0 : i32
    %c0_i32_0 = arith.constant 0 : i32
    %c0_i32_1 = arith.constant 0 : i32
    %c0_i32_2 = arith.constant 0 : i32
    return %c0_i32, %c0_i32_0, %c0_i32_1 : i32, i32, i32
  }
  func.func @transform_10(%arg0: i32) -> (i32, i32, i32) {
    %c0_i32 = arith.constant 0 : i32
    %c0_i32_0 = arith.constant 0 : i32
    %c0_i32_1 = arith.constant 0 : i32
    %c0_i32_2 = arith.constant 0 : i32
    return %c0_i32, %c0_i32_0, %c0_i32_1 : i32, i32, i32
  }
  func.func @transform_11(%arg0: i32) -> (i32, i32, i32) {
    %c0_i32 = arith.constant 0 : i32
    %c0_i32_0 = arith.constant 0 : i32
    %c0_i32_1 = arith.constant 0 : i32
    %c0_i32_2 = arith.constant 0 : i32
    return %c0_i32, %c0_i32_0, %c0_i32_1 : i32, i32, i32
  }
  func.func @transform_12(%arg0: i32) -> (i32, i32, i32) {
    %c0_i32 = arith.constant 0 : i32
    %c0_i32_0 = arith.constant 0 : i32
    %c0_i32_1 = arith.constant 0 : i32
    %c0_i32_2 = arith.constant 0 : i32
    return %c0_i32, %c0_i32_0, %c0_i32_1 : i32, i32, i32
  }
  func.func @transform_13(%arg0: i32) -> (i32, i32, i32) {
    %c0_i32 = arith.constant 0 : i32
    %c0_i32_0 = arith.constant 0 : i32
    %c0_i32_1 = arith.constant 0 : i32
    %c0_i32_2 = arith.constant 0 : i32
    return %c0_i32, %c0_i32_0, %c0_i32_1 : i32, i32, i32
  }
  func.func @transform_14(%arg0: i32) -> (i32, i32, i32) {
    %c0_i32 = arith.constant 0 : i32
    %c0_i32_0 = arith.constant 0 : i32
    %c0_i32_1 = arith.constant 0 : i32
    %c0_i32_2 = arith.constant 0 : i32
    return %c0_i32, %c0_i32_0, %c0_i32_1 : i32, i32, i32
  }
  func.func @transform_15(%arg0: i32) -> (i32, i32, i32) {
    %c0_i32 = arith.constant 0 : i32
    %c0_i32_0 = arith.constant 0 : i32
    %c0_i32_1 = arith.constant 0 : i32
    %c0_i32_2 = arith.constant 0 : i32
    return %c0_i32, %c0_i32_0, %c0_i32_1 : i32, i32, i32
  }
  func.func @transform_16(%arg0: i32) -> (i32, i32, i32) {
    %c0_i32 = arith.constant 0 : i32
    %c0_i32_0 = arith.constant 0 : i32
    %c0_i32_1 = arith.constant 0 : i32
    %c0_i32_2 = arith.constant 0 : i32
    return %c0_i32, %c0_i32_0, %c0_i32_1 : i32, i32, i32
  }
  func.func @transform_17(%arg0: i32) -> (i32, i32, i32) {
    %c0_i32 = arith.constant 0 : i32
    %c0_i32_0 = arith.constant 0 : i32
    %c0_i32_1 = arith.constant 0 : i32
    %c0_i32_2 = arith.constant 0 : i32
    return %c0_i32, %c0_i32_0, %c0_i32_1 : i32, i32, i32
  }
  func.func @transform_18(%arg0: i32) -> (i32, i32, i32) {
    %c0_i32 = arith.constant 0 : i32
    %c0_i32_0 = arith.constant 0 : i32
    %c0_i32_1 = arith.constant 0 : i32
    %c0_i32_2 = arith.constant 0 : i32
    return %c0_i32, %c0_i32_0, %c0_i32_1 : i32, i32, i32
  }
  func.func @transform_19(%arg0: i32) -> (i32, i32) {
    %c0_i32 = arith.constant 0 : i32
    %c0_i32_0 = arith.constant 0 : i32
    %c0_i32_1 = arith.constant 0 : i32
    return %c0_i32, %c0_i32_0 : i32, i32
  }
  func.func @transform_20(%arg0: i32) -> (i32, i32) {
    %c0_i32 = arith.constant 0 : i32
    %c0_i32_0 = arith.constant 0 : i32
    %c0_i32_1 = arith.constant 0 : i32
    return %c0_i32, %c0_i32_0 : i32, i32
  }
  func.func @transform_21(%arg0: i32) -> (i32, i32, i32) {
    %c0_i32 = arith.constant 0 : i32
    %c0_i32_0 = arith.constant 0 : i32
    %c0_i32_1 = arith.constant 0 : i32
    %c0_i32_2 = arith.constant 0 : i32
    return %c0_i32, %c0_i32_0, %c0_i32_1 : i32, i32, i32
  }
  func.func @transform_22(%arg0: i32) -> (i32, i32, i32) {
    %c0_i32 = arith.constant 0 : i32
    %c0_i32_0 = arith.constant 0 : i32
    %c0_i32_1 = arith.constant 0 : i32
    %c0_i32_2 = arith.constant 0 : i32
    return %c0_i32, %c0_i32_0, %c0_i32_1 : i32, i32, i32
  }
  func.func @transform_23(%arg0: i32) -> (i32, i32) {
    %c0_i32 = arith.constant 0 : i32
    %c0_i32_0 = arith.constant 0 : i32
    %c0_i32_1 = arith.constant 0 : i32
    return %c0_i32, %c0_i32_0 : i32, i32
  }
  func.func @transform_24(%arg0: i32) -> (i32, i32) {
    %c0_i32 = arith.constant 0 : i32
    %c0_i32_0 = arith.constant 0 : i32
    %c0_i32_1 = arith.constant 0 : i32
    return %c0_i32, %c0_i32_0 : i32, i32
  }
  func.func @transform_25(%arg0: i32) -> (i32, i32, i32) {
    %c0_i32 = arith.constant 0 : i32
    %c0_i32_0 = arith.constant 0 : i32
    %c0_i32_1 = arith.constant 0 : i32
    return %arg0, %c0_i32, %c0_i32_0 : i32, i32, i32
  }
}

</mosaic_0001>

<bundles_post_ra>
// kernel: squeeze.3
= control target key start
LH: loop header
LB: loop body
LE: loop exit
PB: predicated region body
PF: predicated region fallthrough
CT: control target
= control target key end

     0   :  { %vm7_vm0 = vcmask 23552   ;;  %s39_s0 = inlined_call_operand.vmem [shape: f32[6], index: 0, kind: input, shape index: {}]   ;;  %s40_s1 = inlined_call_operand.vmem [shape: f32[2,3], index: 1, kind: output, shape index: {}]  }
   0x1   :  { %v4_v0 = vld [vmem:[%s39_s0] sm:$0x1]  ;;  %s22_s0 = smov 125  }
   0x2   :  { %5 = vst [vmem:[#allocation1] sm:$0x1] %v4_v0 }
   0x9   :  { %v9_v1 = vld [vmem:[#allocation1] sm:$0x1]  }
   0xa   :  { %v6_v2 = vld [vmem:[#allocation1] sm:$0x1]   ;;  %10 = vrot.lane.b32.xlu0 %v9_v1, %s22_s0 }
   0xb   :  { %8 = vst.msk [vmem:[#allocation0] sm:$0x1] %vm7_vm0, %v6_v2  }
  0x7c   :  { %v11_v3 = vpop.permute.xlu0 %10  }
  0x7d   :  { %14 = vst.msk [vmem:[#allocation0 + $0x1] sm:$0x1] %vm7_vm0, %v11_v3  }
  0x84   :  { %v17_v4 = vld [vmem:[#allocation0] sm:$0x3] }
  0x85   :  { %20 = vst [vmem:[%s40_s1] sm:$0x3] %v17_v4 }

// kernel: qa_forward.3
= control target key start
LH: loop header
LB: loop body
LE: loop exit
PB: predicated region body
PF: predicated region fallthrough
CT: control target
= control target key end

     0   :  { %vm18_vm0 = vcmask 17408   ;;  %s166_s0 = inlined_call_operand.vmem [shape: f32[2,3], index: 0, kind: input, shape index: {}]   ;;  %s167_s1 = inlined_call_operand.vmem [shape: f32[2,3], index: 1, kind: input, shape index: {}]   ;;  %s168_s2 = inlined_call_operand.vmem [shape: s32[2,1], index: 2, kind: output, shape index: {0}]   ;;  %s169_s3 = inlined_call_operand.hbm [shape: f32[1,1], index: 3, kind: output, shape index: {1}]  }
   0x1   :  { %v14_v0 = vld [vmem:[%s166_s0] sm:$0x3] }
   0x2   :  { %9 = vsyncpa [#allocation3], 0  ;;  %v19_v1 = vsel %vm18_vm0, %v14_v0, -inf  ;;  %v44_v2 = vand.u32 2147483647, %v14_v0  ;;  %v41_v8 = vmax.f32 %v14_v0, 0.0  ;;  %v16_v10 = vlaneseq }
   0x3   :  { %20 = vmax.xlane.f32.xlu0 %v19_v1  ;;  %v15_v6 = vld [vmem:[%s167_s1] sm:$0x3]  ;;  %v129_v33 = vmov 6.0   ;;  %s130_s0 = smov [#allocation2]   ;;  %s82_s18 = sshll.u32 %s169_s3, 4  ;;  %vm71_vm4 = vcmask 0   ;;  %s83_s18 = int_to_ptr.hbm [resolvable:$true] %s82_s18 }
   0x4   :  { %v45_v3 = vsub.f32 0.0, %v44_v2  ;;  %v42_v9 = vmul.f32 %v15_v6, %v14_v0  ;;  %v17_v13 = vand.u32 127, %v16_v10  ;;  %s80_s1 = sshll.u32 %s130_s0, 4  ;;  %vm39_vm5 = vcmask 1024   ;;  %s81_s1 = int_to_ptr.vmem [resolvable:$true] %s80_s1 }
   0x6   :  { %v46_v4 = vmul.f32 1.442695, %v45_v3  ;;  %v43_v11 = vsub.f32 %v41_v8, %v42_v9 }
   0x8   :  { %97 = vpow2.f32 %v46_v4 }
   0xe   :  { %v98_v5 = vpop.eup %97 }
   0xf   :  { %v48_v7 = vadd.f32 1.0, %v98_v5 }
  0x11   :  { %99 = vlog2.f32 %v48_v7 }
  0x12   :  { %101 = vrcp.f32 %v129_v33 }
  0x17   :  { %v100_v12 = vpop.eup %99 }
  0x18   :  { %v50_v14 = vmul.f32 0.6931472, %v100_v12  ;;  %v102_v34 = vpop.eup %101 }
  0x19   :  { %v64_v35 = vmul.f32 6.0, %v102_v34  ;;  %vm68_vm3 = vweird.f32 %v102_v34 }
  0x1a   :  { %v51_v16 = vadd.f32 %v50_v14, %v43_v11 }
  0x1b   :  { %v65_v36 = vsub.f32 1.0, %v64_v35 }
  0x1c   :  { %v52_v18 = vsel %vm18_vm0, %v51_v16, 0.0 }
  0x1d   :  { %53 = vadd.xlane.f32.xlu0 %v52_v18  ;;  %v66_v37 = vmul.f32 %v102_v34, %v65_v36 }
  0x1f   :  { %v67_v38 = vadd.f32 %v102_v34, %v66_v37 }
  0x21   :  { %v69_v39 = vsel %vm68_vm3, %v102_v34, %v67_v38 }
  0x76   :  { %v21_v15 = vpop.xlane.xlu0 %20 }
  0x77   :  { %vm22_vm1 = vcmp.eq.f32.partialorder %v14_v0, %v21_v15 }
  0x78   :  { %v23_v17 = vsel %vm22_vm1, %v17_v13, 3 }
  0x79   :  { %v24_v19 = vsel %vm18_vm0, %v23_v17, 2147483647 }
  0x7a   :  { %v26_v20 = vshra.s32 %v24_v19, 16  ;;  %v25_v23 = vand.u32 65535, %v24_v19 }
  0x7c   :  { %v28_v21 = vcvt.s32.f32 %v26_v20  ;;  %v27_v27 = vcvt.s32.f32 %v25_v23 }
  0x7e   :  { %29 = vmin.xlane.f32.xlu1 %v28_v21 }
  0x90   :  { %v54_v22 = vpop.xlane.xlu0 %53 }
  0x91   :  { %v55_v24 = vrot.slane %v54_v22, 4 }
  0x93   :  { %v56_v25 = vadd.f32 %v55_v24, %v54_v22 }
  0x95   :  { %v57_v28 = vrot.slane %v56_v25, 2 }
  0x97   :  { %v58_v30 = vadd.f32 %v57_v28, %v56_v25 }
  0x99   :  { %v59_v31 = vrot.slane %v58_v30, 1 }
  0x9b   :  { %v60_v32 = vadd.f32 %v59_v31, %v58_v30 }
  0x9d   :  { %93 = vpush %v60_v32 }
  0xce   :  { %s94_s19 = spop %93 }
  0xcf   :  { %v62_v40 = vstv %s94_s19 }
  0xd0   :  { %v70_v41 = vmul.f32 %v69_v39, %v62_v40 }
  0xd2   :  { %72 = vst.msk [vmem:[#allocation2] sm:$0x1] %vm71_vm4, %v70_v41 }
  0xd3   :  { %85 = dma.vmem_to_hbm [thread:$0]  %s81_s1, 16, %s83_s18, [#allocation3]  }
  0xf1   :  { %v30_v26 = vpop.xlane.xlu1 %29 }
  0xf2   :  { %vm31_vm2 = vcmp.eq.f32.partialorder %v28_v21, %v30_v26  ;;  %v36_v42 = vcvt.f32.s32 %v30_v26 }
  0xf3   :  { %v32_v29 = vsel %vm31_vm2, %v27_v27, inf }
  0xf4   :  { %33 = vmin.xlane.f32.xlu1 %v32_v29  ;;  %v37_v44 = vshll.u32 %v36_v42, 16 }
 0x167   :  { %v34_v43 = vpop.xlane.xlu1 %33 }
 0x168   :  { %v35_v45 = vcvt.f32.s32 %v34_v43 }
 0x16a   :  { %v38_v46 = vadd.s32 %v37_v44, %v35_v45 }
 0x16c   :  { %40 = vst.msk [vmem:[%s168_s2] sm:$0x3] %vm39_vm5, %v38_v46 }
 0x16d   :  { %127 = dma.done.wait [#allocation3], 16  }
 0x16e   :  { %128 = vsyncadd [#allocation3], 4294967280 }
 0x16f   :  { %92 = vsyncpa [#allocation3], 1 }

// kernel: qa_forward.2
= control target key start
LH: loop header
LB: loop body
LE: loop exit
PB: predicated region body
PF: predicated region fallthrough
CT: control target
= control target key end

     0   :  { %s2372_s0 = inlined_call_operand.vmem [shape: s32[6,8,1], index: 0, kind: input, shape index: {}]   ;;  %s2373_s1 = inlined_call_operand.vmem [shape: f32[6,1,8], index: 1, kind: input, shape index: {}]   ;;  %s2374_s2 = inlined_call_operand.vmem [shape: f32[128,32], index: 2, kind: input, shape index: {}]   ;;  %s2375_s3 = inlined_call_operand.vmem [shape: f32[8,32], index: 3, kind: input, shape index: {}]   ;;  %s2376_s4 = inlined_call_operand.vmem [shape: f32[1,32], index: 4, kind: input, shape index: {}]   ;;  %s2377_s5 = inlined_call_operand.vmem [shape: f32[1,32], index: 5, kind: input, shape index: {}]   ;;  %s2378_s6 = inlined_call_operand.vmem [shape: f32[1,32], index: 6, kind: input, shape index: {}]   ;;  %s2379_s7 = inlined_call_operand.vmem [shape: f32[2,32,96], index: 7, kind: input, shape index: {}]   ;;  %s2380_s8 = inlined_call_operand.vmem [shape: f32[2,1,96], index: 8, kind: input, shape index: {}]   ;;  %s2381_s9 = inlined_call_operand.vmem [shape: f32[2,32,32], index: 9, kind: input, shape index: {}]   ;;  %s2382_s10 = inlined_call_operand.vmem [shape: f32[2,1,32], index: 10, kind: input, shape index: {}]   ;;  %s2383_s11 = inlined_call_operand.vmem [shape: f32[2,1,32], index: 11, kind: input, shape index: {}]   ;;  %s2384_s12 = inlined_call_operand.vmem [shape: f32[2,1,32], index: 12, kind: input, shape index: {}]   ;;  %s2385_s13 = inlined_call_operand.vmem [shape: f32[2,32,64], index: 13, kind: input, shape index: {}]   ;;  %s2386_s14 = inlined_call_operand.vmem [shape: f32[2,1,64], index: 14, kind: input, shape index: {}]   ;;  %s2387_s15 = inlined_call_operand.vmem [shape: f32[2,64,32], index: 15, kind: input, shape index: {}]   ;;  %s2388_s16 = inlined_call_operand.vmem [shape: f32[2,1,32], index: 16, kind: input, shape index: {}]   ;;  %s2389_s17 = inlined_call_operand.vmem [shape: f32[2,1,32], index: 17, kind: input, shape index: {}]   ;;  %s2390_s18 = inlined_call_operand.vmem [shape: f32[2,1,32], index: 18, kind: input, shape index: {}]   ;;  %s2391_s19 = inlined_call_operand.vmem [shape: f32[32,32], index: 19, kind: input, shape index: {}]   ;;  %s2392_s20 = inlined_call_operand.vmem [shape: f32[1,32], index: 20, kind: input, shape index: {}]   ;;  %s2393_s21 = inlined_call_operand.vmem [shape: f32[1,32,32], index: 21, kind: input, shape index: {}]   ;;  %s2394_s22 = inlined_call_operand.vmem [shape: f32[1,1,32], index: 22, kind: input, shape index: {}]   ;;  %s2395_s23 = inlined_call_operand.vmem [shape: f32[32,1], index: 23, kind: input, shape index: {}]   ;;  %s2396_s24 = inlined_call_operand.<no memory space> [shape: f32[1,1], index: 24, kind: input, shape index: {}]   ;;  %s2397_s25 = inlined_call_operand.vmem [shape: f32[6,1,128], index: 25, kind: output, shape index: {}]  }
   0x1   :  { %2408 = sst [smem:[#allocation3_spill]] %s2372_s0  ;;  %v30_v0 = vstv %s2396_s24 }
   0x2   :  { %2409 = sst [smem:[#allocation4_spill]] %s2373_s1  ;;  %31 = vst [vmem:[#allocation2] sm:$0x1] %v30_v0 }
   0x3   :  { %2410 = sst [smem:[#allocation5_spill]] %s2374_s2 }
   0x4   :  { %2411 = sst [smem:[#allocation6_spill]] %s2375_s3 }
   0x5   :  { %2412 = sst [smem:[#allocation7_spill]] %s2376_s4 }
   0x6   :  { %2413 = sst [smem:[#allocation8_spill]] %s2377_s5 }
   0x7   :  { %2414 = sst [smem:[#allocation9_spill]] %s2378_s6  ;;  %s1996_s6 = smov 0  }
   0x8   :  { %2415 = sst [smem:[#allocation10_spill]] %s2379_s7 }
   0x9   :  { %2416 = sst [smem:[#allocation11_spill]] %s2380_s8 }
   0xa   :  { %2417 = sst [smem:[#allocation12_spill]] %s2381_s9 }
   0xb LB: > { %s1715_s30 = sadd.s32 4294967295, %s1852_s6   ;;  %p1719_p0 = scmp.ge.s32.totalorder %s1852_s6, 1  ;;  %s1852_s6 = sphi %s1996_s6, %s37_s6  }
   0xc   : > { %p696_p1 = scmp.lt.s32.totalorder %s1852_s6, 7 }
   0xe   : > { %p697_p2 = pnand %p1719_p0, %p696_p1 }
   0xf   : > { %p764_p3 = scmp.lt.s32.totalorder (!%p697_p2), %s1715_s30, 5  ;;  %s2418_s24 = sld [smem:[#allocation5_spill]] (!%p697_p2) }
  0x10   : > { %700 = sbr.rel (%p697_p2) target bundleno = 5101 (0x13ed), region = 120  ;;  %s2419_s29 = sld [smem:[#allocation3_spill]] (!%p697_p2) }
  0x11   : > { %s2420_s7 = sld [smem:[#allocation6_spill]] (!%p697_p2)  ;;  %s2403_s0 = smov (!%p697_p2), 48  }
  0x12   : > { %s2421_s1 = sld [smem:[#allocation7_spill]] (!%p697_p2)  ;;  %s2402_s8 = smov (!%p697_p2), 64  }
  0x13   : > { %s2422_s28 = sld [smem:[#allocation10_spill]] (!%p697_p2)  ;;  %s2431_s3 = smov (!%p697_p2), 48  }
  0x14   : > { %s2423_s26 = sld [smem:[#allocation8_spill]] (!%p697_p2) }
  0x15   : > { %v798_v1 = vld [vmem:[%s2418_s24 + $0x78] sm:$0xff]  ;;  %v797_v2 = vld [vmem:[%s2418_s24 + $0x70] sm:$0xff]  ;;  %v1854_v3 = vmov 0   ;;  %s2435_s30 = smov (!%p764_p3, %s1715_s30), 5  ;;  %v796_v4 = vld [vmem:[%s2418_s24 + $0x68] sm:$0xff]  ;;  %v775_v19 = vlaneseq  ;;  %v1855_v22 = vmov 1.0  }
  0x16   : > { %1793 = vset.pattern.permute.xlu0 %v1854_v3  ;;  %800 = vmatpush.msra.mxu0 %v798_v1  ;;  %s1720_s4 = sshll.u32 %s2435_s30, 3  ;;  %v795_v5 = vld [vmem:[%s2418_s24 + $0x60] sm:$0xff]  ;;  %v794_v6 = vld [vmem:[%s2418_s24 + $0x58] sm:$0xff]  ;;  %v793_v8 = vld [vmem:[%s2418_s24 + $0x50] sm:$0xff]  ;;  %vm827_vm1 = vcmask 261120   ;;  %v1856_v29 = vmov 32.0  }
  0x17   : > { %1794 = vset.pattern.permute.xlu2 %v1854_v3  ;;  %s767_s2 = scalar_lea.vmem %s2419_s29, %s1720_s4  ;;  %v792_v9 = vld [vmem:[%s2418_s24 + $0x48] sm:$0xff]  ;;  %v791_v10 = vld [vmem:[%s2418_s24 + $0x40] sm:$0xff]  ;;  %v790_v11 = vld [vmem:[%s2418_s24 + $0x38] sm:$0xff]  ;;  %v776_v20 = vand.u32 127, %v775_v19  ;;  %1814 = vrcp.f32 %v1856_v29  ;;  %s2424_s27 = sld [smem:[#allocation9_spill]]  ;;  %vm902_vm6 = vcmask 130048  }
  0x18   : > { %801 = vmatpush.msra.mxu0 %v797_v2  ;;  %v774_v7 = vld [vmem:[%s767_s2] sm:$0xff]  ;;  %v789_v12 = vld [vmem:[%s2418_s24 + $0x30] sm:$0xff]  ;;  %v788_v13 = vld [vmem:[%s2418_s24 + $0x28] sm:$0xff]  ;;  %s2425_s5 = sld [smem:[#allocation11_spill]]  ;;  %s2404_s29 = smov 96   ;;  %vm932_vm7 = vcmask 64512  }
  0x19   : > { %778 = vperm.xlu0 %1793, %v774_v7   ;;  %v787_v14 = vld [vmem:[%s2418_s24 + $0x20] sm:$0xff]  ;;  %v786_v15 = vld [vmem:[%s2418_s24 + $0x18] sm:$0xff]  ;;  %v785_v16 = vld [vmem:[%s2418_s24 + $0x10] sm:$0xff]  ;;  %s2405_s2 = smov 80   ;;  %vm1158_vm11 = vcmask 523264  }
  0x1a   : > { %802 = vmatpush.msra.mxu0 %v796_v4  ;;  %v784_v17 = vld [vmem:[%s2418_s24 + $0x8] sm:$0xff]  ;;  %v783_v18 = vld [vmem:[%s2418_s24] sm:$0xff]  ;;  %v871_v41 = vld [vmem:[%s2422_s28 + $0x18] sm:$0xff] }
  0x1b   : > { %v799_v23 = vld [vmem:[%s2420_s7] sm:$0xff]  ;;  %891 = vmatpush.msra.mxu1 %v871_v41  ;;  %v870_v42 = vld [vmem:[%s2422_s28 + $0x10] sm:$0xff]  ;;  %v869_v43 = vld [vmem:[%s2422_s28 + $0x8] sm:$0xff]  ;;  %s2427_s7 = sld [smem:[#allocation12_spill]] }
  0x1c   : > { %803 = vmatpush.msra.mxu0 %v795_v5  ;;  %v1795_v24 = vld [vmem:[%s2421_s1] ss:$0 sm:$0xff] }
  0x1d   : > { %v1815_v30 = vpop.eup %1814  ;;  %892 = vmatpush.msra.mxu1 %v870_v42  ;;  %v868_v44 = vld [vmem:[%s2422_s28] sm:$0xff] }
  0x1e   : > { %804 = vmatpush.msra.mxu0 %v794_v6  ;;  %v832_v31 = vmul.f32 32.0, %v1815_v30  ;;  %vm836_vm2 = vweird.f32 %v1815_v30  ;;  %v1796_v54 = vld [vmem:[%s2423_s26] ss:$0 sm:$0xff]  ;;  %s2426_s26 = sld [smem:[#allocation4_spill]] }
  0x1f   : > { %893 = vmatpush.msra.mxu1 %v869_v43  ;;  %v1797_v57 = vld [vmem:[%s2424_s27] ss:$0 sm:$0xff]  ;;  %s2407_s27 = smov 112  }
  0x20   : > { %805 = vmatpush.msra.mxu0 %v793_v8  ;;  %v833_v32 = vsub.f32 1.0, %v832_v31  ;;  %v1798_v60 = vld [vmem:[%s2425_s5] ss:$0 sm:$0xff] }
  0x21   : > { %894 = vmatpush.msra.mxu1 %v868_v44  ;;  %v1799_v41 = vld [vmem:[%s2382_s10] ss:$0 sm:$0xff] }
  0x22   : > { %806 = vmatpush.msra.mxu0 %v792_v9  ;;  %v834_v33 = vmul.f32 %v1815_v30, %v833_v32 }
  0x24   : > { %807 = vmatpush.msra.mxu0 %v791_v10  ;;  %v835_v34 = vadd.f32 %v1815_v30, %v834_v33  ;;  %s770_s1 = scalar_lea.vmem %s2426_s26, %s2435_s30  ;;  %v1045_v33 = vld [vmem:[%s2427_s7 + $0x18] sm:$0xff] }
  0x25   : > { %v865_v1 = vld [vmem:[%s770_s1] sm:$0x1]  ;;  %1065 = vmatpush.msrb.mxu1 %v1045_v33 }
  0x26   : > { %808 = vmatpush.msra.mxu0 %v790_v11  ;;  %v2065_v35 = vsel %vm836_vm2, %v1815_v30, %v835_v34  ;;  %v866_v2 = vsub.f32 1.0, %v865_v1  ;;  %v1044_v34 = vld [vmem:[%s2427_s7 + $0x10] sm:$0xff] }
  0x27   : > { %1066 = vmatpush.msrb.mxu1 %v1044_v34 }
  0x28   : > { %809 = vmatpush.msra.mxu0 %v789_v12  ;;  %v867_v3 = vmul.f32 -1e+09, %v866_v2 }
  0x2a   : > { %810 = vmatpush.msra.mxu0 %v788_v13  ;;  %v2104_v4 = vperm.slane %v867_v3, 0  ;;  %v1801_v3 = vld [vmem:[%s2384_s12] ss:$0 sm:$0xff] }
  0x2c   : > { %811 = vmatpush.msra.mxu0 %v787_v14 }
  0x2e   : > { %812 = vmatpush.msra.mxu0 %v786_v15 }
  0x30   : > { %813 = vmatpush.msra.mxu0 %v785_v16 }
  0x32   : > { %814 = vmatpush.msra.mxu0 %v784_v17 }
  0x34   : > { %815 = vmatpush.msra.mxu0 %v783_v18 }
  0x8b   : > { %v779_v21 = vpop.permute.xlu0 %778 }
  0x8c   : > { %vm780_vm0 = vcmp.eq.s32.totalorder %v776_v20, %v779_v21 }
  0x8d   : > { %1722 = vmatmul.msk.f32.vlgmr.msra.gmra.mxu0 %vm780_vm0, %v1855_v22 }
 0x10a   : > { %v817_v25 = vpop.f32.mrf.mxu0 }
 0x10b   : > { %v818_v26 = vadd.f32 %v817_v25, %v799_v23 }
 0x10d   : > { %v824_v27 = vadd.f32 %v1795_v24, %v818_v26 }
 0x10f   : > { %v828_v28 = vsel %vm827_vm1, %v824_v27, 0.0 }
 0x110   : > { %829 = vadd.xlane.f32.xlu0 %v828_v28 }
 0x183   : > { %v830_v36 = vpop.xlane.xlu0 %829 }
 0x184   : > { %v838_v37 = vmul.f32 %v2065_v35, %v830_v36  ;;  %v1043_v36 = vld [vmem:[%s2427_s7 + $0x8] sm:$0xff] }
 0x185   : > { %1067 = vmatpush.msrb.mxu1 %v1043_v36 }
 0x186   : > { %v839_v38 = vsub.f32 %v824_v27, %v838_v37 }
 0x188   : > { %v840_v39 = vmul.f32 %v839_v38, %v839_v38 }
 0x18a   : > { %v841_v40 = vsel %vm827_vm1, %v840_v39, 0.0 }
 0x18b   : > { %842 = vadd.xlane.f32.xlu1 %v841_v40 }
 0x1fe   : > { %v843_v45 = vpop.xlane.xlu1 %842 }
 0x1ff   : > { %v844_v46 = vmul.f32 %v843_v45, %v2065_v35 }
 0x201   : > { %v845_v47 = vadd.f32 1e-12, %v844_v46 }
 0x203   : > { %1816 = vrsqrt.f32 %v845_v47  ;;  %vm852_vm4 = vweird.f32 %v845_v47 }
 0x209   : > { %v1817_v48 = vpop.eup %1816 }
 0x20a   : > { %v847_v49 = vmul.f32 %v1817_v48, %v845_v47  ;;  %vm853_vm3 = vweird.f32 %v1817_v48 }
 0x20b   : > { %vm854_vm5 = vmor %vm852_vm4, %vm853_vm3 }
 0x20c   : > { %v848_v50 = vmul.f32 %v1817_v48, %v847_v49 }
 0x20e   : > { %v849_v51 = vmul.f32 0.5, %v848_v50 }
 0x210   : > { %v850_v52 = vsub.f32 1.5, %v849_v51  ;;  %v1109_v51 = vld [vmem:[%s2385_s13 + $0x18] sm:$0xff] }
 0x212   : > { %v851_v53 = vmul.f32 %v1817_v48, %v850_v52  ;;  %v1108_v52 = vld [vmem:[%s2385_s13 + $0x10] sm:$0xff] }
 0x214   : > { %v855_v55 = vsel %vm854_vm5, %v1817_v48, %v851_v53  ;;  %v1107_v53 = vld [vmem:[%s2385_s13 + $0x8] sm:$0xff] }
 0x215   : > { %v856_v56 = vmul.f32 %v855_v55, %v839_v38  ;;  %v1042_v38 = vld [vmem:[%s2427_s7] sm:$0xff] }
 0x216   : > { %1068 = vmatpush.msrb.mxu1 %v1042_v38  ;;  %v1736_v38 = vld [vmem:[%s2422_s28 + $0x38] sm:$0xff] }
 0x217   : > { %v860_v58 = vmul.f32 %v1796_v54, %v856_v56  ;;  %v1106_v54 = vld [vmem:[%s2385_s13] sm:$0xff] }
 0x219   : > { %v2088_v59 = vadd.f32 %v1797_v57, %v860_v58 }
 0x21b   : > { %1723 = vmatmul.msk.f32.vlgmr.msra.gmra.mxu1 %vm827_vm1, %v2088_v59 }
 0x21c   : > { %1240 = vmatpush.msra.mxu1 %v1736_v38 }
 0x298   : > { %v896_v61 = vpop.f32.mrf.mxu1 }
 0x299   : > { %v897_v62 = vadd.f32 %v1798_v60, %v896_v61 }
 0x29b   : > { %1011 = vrot.lane.b32.xlu0 %v897_v62, %s2403_s0  ;;  %900 = vrot.lane.b32.xlu1 %v897_v62, %s2404_s29  ;;  %s2406_s0 = smov 16   ;;  %s2428_s29 = smov 112  }
 0x2a3   : > { %972 = vrot.lane.b32.xlu1 %v897_v62, %s2405_s2  ;;  %s2429_s2 = smov 80  }
 0x30d   : > { %v1012_v63 = vpop.permute.xlu0 %1011  ;;  %v901_v0 = vpop.permute.xlu1 %900 }
 0x30e   : > { %1724 = vmatpush.xpose.msk.msra.mxu2 %vm902_vm6, %v901_v0  ;;  %v1800_v0 = vld [vmem:[%s2383_s11] ss:$0 sm:$0xff] }
 0x311   : > { %1725 = vmatmul.msk.f32.vlgmr.msra.gmra.mxu2 %vm902_vm6, %v897_v62 }
 0x312   : > { %1032 = vmatpush.msrb.mxu2 %v1012_v63 }
 0x315   : > { %v973_v13 = vpop.permute.xlu1 %972 }
 0x394   : > { %v924_v5 = vpop.f32.mrf.mxu2 }
 0x395   : > { %v927_v6 = vmul.f32 0.25, %v924_v5 }
 0x397   : > { %v931_v7 = vadd.f32 %v2104_v4, %v927_v6 }
 0x399   : > { %v933_v8 = vsel %vm932_vm7, %v931_v7, -inf }
 0x39a   : > { %934 = vmax.xlane.f32.xlu2 %v933_v8  ;;  %v1152_v8 = vld [vmem:[%s2387_s15 + $0x30] sm:$0xff] }
 0x3b2   : > { %944 = vrot.lane.b32.xlu2 %v897_v62, %s2402_s8  ;;  %s2430_s8 = smov 96  }
 0x40d   : > { %v935_v9 = vpop.xlane.xlu2 %934 }
 0x40e   : > { %v936_v10 = vsub.f32 %v931_v7, %v935_v9  ;;  %v1153_v7 = vld [vmem:[%s2387_s15 + $0x38] sm:$0xff]  ;;  %v1151_v9 = vld [vmem:[%s2387_s15 + $0x28] sm:$0xff] }
 0x40f   : > { %1170 = vmatpush.msra.mxu2 %v1153_v7 }
 0x410   : > { %v937_v11 = vmul.f32 1.442695, %v936_v10  ;;  %v1150_v10 = vld [vmem:[%s2387_s15 + $0x20] sm:$0xff] }
 0x411   : > { %1171 = vmatpush.msra.mxu2 %v1152_v8 }
 0x412   : > { %1818 = vpow2.f32 %v937_v11  ;;  %v1149_v11 = vld [vmem:[%s2387_s15 + $0x18] sm:$0xff] }
 0x413   : > { %1172 = vmatpush.msra.mxu2 %v1151_v9 }
 0x415   : > { %v945_v12 = vpop.permute.xlu2 %944  ;;  %1173 = vmatpush.msra.mxu2 %v1150_v10 }
 0x416   : > { %965 = vmatpush.msra.mxu3 %v945_v12  ;;  %v1148_v12 = vld [vmem:[%s2387_s15 + $0x10] sm:$0xff] }
 0x417   : > { %1174 = vmatpush.msra.mxu2 %v1149_v11 }
 0x418   : > { %1727 = vmatpush.xpose.msk.msrb.mxu3 %vm902_vm6, %v973_v13  ;;  %v1819_v14 = vpop.eup %1818  ;;  %v1147_v13 = vld [vmem:[%s2387_s15 + $0x8] sm:$0xff] }
 0x419   : > { %v939_v15 = vsel %vm932_vm7, %v1819_v14, 0.0  ;;  %1175 = vmatpush.msra.mxu2 %v1148_v12 }
 0x41a   : > { %940 = vadd.xlane.f32.xlu2 %v939_v15  ;;  %v1802_v15 = vld [vmem:[%s2386_s14] ss:$0 sm:$0xff] }
 0x41b   : > { %1176 = vmatpush.msra.mxu2 %v1147_v13 }
 0x432   : > { %970 = vrot.lane.b32.xlu2 %v897_v62, %s2407_s27 }
 0x48d   : > { %v941_v16 = vpop.xlane.xlu2 %940 }
 0x48e   : > { %1820 = vrcp.f32 %v941_v16 }
 0x494   : > { %v1821_v17 = vpop.eup %1820 }
 0x495   : > { %v943_v18 = vmul.f32 %v1821_v17, %v1819_v14  ;;  %v971_v19 = vpop.permute.xlu2 %970  ;;  %v1146_v14 = vld [vmem:[%s2387_s15] sm:$0xff] }
 0x496   : > { %1177 = vmatpush.msra.mxu2 %v1146_v14 }
 0x497   : > { %1726 = vmatmul.msk.f32.vlgmr.msra.gmra.mxu3 %vm932_vm7, %v943_v18 }
 0x498   : > { %1129 = vmatpush.msra.mxu3 %v1109_v51  ;;  %v1804_v51 = vld [vmem:[%s2389_s17] ss:$0 sm:$0xff] }
 0x49a   : > { %1130 = vmatpush.msra.mxu3 %v1108_v52 }
 0x49c   : > { %1131 = vmatpush.msra.mxu3 %v1107_v53 }
 0x49e   : > { %1132 = vmatpush.msra.mxu3 %v1106_v54  ;;  %v1805_v54 = vld [vmem:[%s2390_s18] ss:$0 sm:$0xff] }
 0x49f   : > { %1728 = vmatmul.msk.f32.vlgmr.msrb.gmra.mxu3 %vm902_vm6, %v971_v19 }
 0x51a   : > { %v967_v20 = vpop.f32.mrf.mxu3 }
 0x522   : > { %v995_v21 = vpop.f32.mrf.mxu3 }
 0x523   : > { %v998_v22 = vmul.f32 0.25, %v995_v21 }
 0x525   : > { %v999_v23 = vadd.f32 %v998_v22, %v2104_v4 }
 0x527   : > { %v1000_v24 = vsel %vm932_vm7, %v999_v23, -inf }
 0x528   : > { %1001 = vmax.xlane.f32.xlu1 %v1000_v24 }
 0x59b   : > { %v1002_v25 = vpop.xlane.xlu1 %1001 }
 0x59c   : > { %v1003_v26 = vsub.f32 %v999_v23, %v1002_v25 }
 0x59e   : > { %v1004_v27 = vmul.f32 1.442695, %v1003_v26 }
 0x5a0   : > { %1822 = vpow2.f32 %v1004_v27  ;;  %v1803_v27 = vld [vmem:[%s2388_s16] ss:$0 sm:$0xff] }
 0x5a6   : > { %v1823_v28 = vpop.eup %1822 }
 0x5a7   : > { %v1006_v29 = vsel %vm932_vm7, %v1823_v28, 0.0 }
 0x5a8   : > { %1007 = vadd.xlane.f32.xlu2 %v1006_v29 }
 0x61b   : > { %v1008_v30 = vpop.xlane.xlu2 %1007 }
 0x61c   : > { %1824 = vrcp.f32 %v1008_v30 }
 0x622   : > { %v1825_v31 = vpop.eup %1824 }
 0x623   : > { %v1010_v32 = vmul.f32 %v1825_v31, %v1823_v28 }
 0x625   : > { %1729 = vmatmul.msk.f32.vlgmr.msrb.gmra.mxu2 %vm932_vm7, %v1010_v32 }
 0x6a8   : > { %v1034_v37 = vpop.f32.mrf.mxu2 }
 0x6a9   : > { %1038 = vrot.lane.b32.xlu0 %v1034_v37, %s2406_s0  ;;  %s2432_s0 = smov 64  }
 0x71b   : > { %v1039_v39 = vpop.permute.xlu0 %1038 }
 0x71c   : > { %v1041_v40 = vsel %vm902_vm6, %v967_v20, %v1039_v39  ;;  %v1735_v39 = vld [vmem:[%s2422_s28 + $0x30] sm:$0xff] }
 0x71d   : > { %1730 = vmatmul.msk.f32.vlgmr.msrb.gmra.mxu1 %vm827_vm1, %v1041_v40  ;;  %v1734_v40 = vld [vmem:[%s2422_s28 + $0x28] sm:$0xff] }
 0x71e   : > { %1241 = vmatpush.msra.mxu1 %v1735_v39 }
 0x720   : > { %1242 = vmatpush.msra.mxu1 %v1734_v40 }
 0x79a   : > { %v1070_v42 = vpop.f32.mrf.mxu1 }
 0x79b   : > { %v1071_v43 = vadd.f32 %v1799_v41, %v1070_v42  ;;  %v1733_v41 = vld [vmem:[%s2422_s28 + $0x20] sm:$0xff] }
 0x79c   : > { %1243 = vmatpush.msra.mxu1 %v1733_v41 }
 0x79d   : > { %v1073_v44 = vadd.f32 %v1071_v43, %v2088_v59 }
 0x79f   : > { %v1076_v45 = vsel %vm827_vm1, %v1073_v44, 0.0 }
 0x7a0   : > { %1077 = vadd.xlane.f32.xlu0 %v1076_v45 }
 0x813   : > { %v1078_v46 = vpop.xlane.xlu0 %1077 }
 0x814   : > { %v1079_v47 = vmul.f32 %v1078_v46, %v2065_v35 }
 0x816   : > { %v1080_v48 = vsub.f32 %v1073_v44, %v1079_v47 }
 0x818   : > { %v1081_v49 = vmul.f32 %v1080_v48, %v1080_v48 }
 0x81a   : > { %v1082_v50 = vsel %vm827_vm1, %v1081_v49, 0.0 }
 0x81b   : > { %1083 = vadd.xlane.f32.xlu1 %v1082_v50 }
 0x88e   : > { %v1084_v55 = vpop.xlane.xlu1 %1083 }
 0x88f   : > { %v1085_v56 = vmul.f32 %v1084_v55, %v2065_v35 }
 0x891   : > { %v1086_v57 = vadd.f32 1e-12, %v1085_v56 }
 0x893   : > { %1826 = vrsqrt.f32 %v1086_v57  ;;  %vm1093_vm9 = vweird.f32 %v1086_v57 }
 0x899   : > { %v1827_v58 = vpop.eup %1826 }
 0x89a   : > { %v1088_v59 = vmul.f32 %v1827_v58, %v1086_v57  ;;  %vm1094_vm8 = vweird.f32 %v1827_v58  ;;  %v1806_v57 = vld [vmem:[%s2425_s5 + $0x1] ss:$0 sm:$0xff] }
 0x89b   : > { %vm1095_vm10 = vmor %vm1093_vm9, %vm1094_vm8 }
 0x89c   : > { %v1089_v60 = vmul.f32 %v1827_v58, %v1088_v59 }
 0x89e   : > { %v1090_v61 = vmul.f32 0.5, %v1089_v60 }
 0x8a0   : > { %v1091_v62 = vsub.f32 1.5, %v1090_v61 }
 0x8a2   : > { %v1092_v63 = vmul.f32 %v1827_v58, %v1091_v62 }
 0x8a4   : > { %v1096_v1 = vsel %vm1095_vm10, %v1827_v58, %v1092_v63 }
 0x8a5   : > { %v1097_v2 = vmul.f32 %v1096_v1, %v1080_v48 }
 0x8a7   : > { %v1101_v5 = vmul.f32 %v1800_v0, %v1097_v2 }
 0x8a9   : > { %v1105_v6 = vadd.f32 %v1801_v3, %v1101_v5 }
 0x8ab   : > { %1731 = vmatmul.msk.f32.vlgmr.msra.gmra.mxu3 %vm827_vm1, %v1105_v6 }
 0x92e   : > { %v1134_v16 = vpop.f32.mrf.mxu3 }
 0x92f   : > { %v1135_v17 = vadd.f32 %v1802_v15, %v1134_v16 }
 0x931   : > { %v1137_v18 = vmul.f32 %v1135_v17, %v1135_v17 }
 0x933   : > { %v1138_v19 = vmul.f32 %v1137_v18, %v1135_v17 }
 0x935   : > { %v1139_v20 = vmul.f32 0.044715, %v1138_v19 }
 0x937   : > { %v1140_v21 = vadd.f32 %v1139_v20, %v1135_v17 }
 0x939   : > { %v1141_v22 = vmul.f32 0.7978846, %v1140_v21 }
 0x93b   : > { %1828 = vtanh.f32 %v1141_v22 }
 0x941   : > { %v1829_v23 = vpop.eup %1828 }
 0x942   : > { %v1143_v24 = vadd.f32 1.0, %v1829_v23 }
 0x944   : > { %v1144_v25 = vmul.f32 0.5, %v1143_v24 }
 0x946   : > { %v1145_v26 = vmul.f32 %v1144_v25, %v1135_v17  ;;  %v1748_v25 = vld [vmem:[%s2427_s7 + $0x38] sm:$0xff] }
 0x947   : > { %1411 = vmatpush.msrb.mxu0 %v1748_v25 }
 0x948   : > { %1732 = vmatmul.msk.f32.vlgmr.msra.gmra.mxu2 %vm1158_vm11, %v1145_v26  ;;  %v1747_v26 = vld [vmem:[%s2427_s7 + $0x30] sm:$0xff] }
 0x949   : > { %1412 = vmatpush.msrb.mxu0 %v1747_v26 }
 0x9cb   : > { %v1179_v28 = vpop.f32.mrf.mxu2 }
 0x9cc   : > { %v1180_v29 = vadd.f32 %v1803_v27, %v1179_v28  ;;  %v1746_v27 = vld [vmem:[%s2427_s7 + $0x28] sm:$0xff] }
 0x9cd   : > { %1413 = vmatpush.msrb.mxu0 %v1746_v27 }
 0x9ce   : > { %v1182_v30 = vadd.f32 %v1180_v29, %v1105_v6  ;;  %v1745_v29 = vld [vmem:[%s2427_s7 + $0x20] sm:$0xff] }
 0x9cf   : > { %1414 = vmatpush.msrb.mxu0 %v1745_v29  ;;  %v1571_v29 = vld [vmem:[%s2391_s19 + $0x18] sm:$0xff] }
 0x9d0   : > { %v1185_v31 = vsel %vm827_vm1, %v1182_v30, 0.0 }
 0x9d1   : > { %1186 = vadd.xlane.f32.xlu2 %v1185_v31 }
 0xa44   : > { %v1187_v32 = vpop.xlane.xlu2 %1186 }
 0xa45   : > { %v1188_v33 = vmul.f32 %v1187_v32, %v2065_v35 }
 0xa47   : > { %v1189_v34 = vsub.f32 %v1182_v30, %v1188_v33  ;;  %v1807_v33 = vld [vmem:[%s2382_s10 + $0x1] ss:$0 sm:$0xff] }
 0xa49   : > { %v1190_v36 = vmul.f32 %v1189_v34, %v1189_v34 }
 0xa4b   : > { %v1191_v37 = vsel %vm827_vm1, %v1190_v36, 0.0 }
 0xa4c   : > { %1192 = vadd.xlane.f32.xlu1 %v1191_v37 }
 0xabf   : > { %v1193_v42 = vpop.xlane.xlu1 %1192 }
 0xac0   : > { %v1194_v43 = vmul.f32 %v1193_v42, %v2065_v35 }
 0xac2   : > { %v1195_v44 = vadd.f32 1e-12, %v1194_v43 }
 0xac4   : > { %1830 = vrsqrt.f32 %v1195_v44  ;;  %vm1202_vm13 = vweird.f32 %v1195_v44 }
 0xaca   : > { %v1831_v45 = vpop.eup %1830 }
 0xacb   : > { %v1197_v46 = vmul.f32 %v1831_v45, %v1195_v44  ;;  %vm1203_vm12 = vweird.f32 %v1831_v45  ;;  %v1756_v44 = vld [vmem:[%s2385_s13 + $0x38] sm:$0xff] }
 0xacc   : > { %vm1204_vm14 = vmor %vm1202_vm13, %vm1203_vm12 }
 0xacd   : > { %v1198_v47 = vmul.f32 %v1831_v45, %v1197_v46  ;;  %v1754_v46 = vld [vmem:[%s2385_s13 + $0x28] sm:$0xff] }
 0xacf   : > { %v1199_v48 = vmul.f32 0.5, %v1198_v47  ;;  %v1753_v47 = vld [vmem:[%s2385_s13 + $0x20] sm:$0xff] }
 0xad1   : > { %v1200_v49 = vsub.f32 1.5, %v1199_v48 }
 0xad3   : > { %v1201_v50 = vmul.f32 %v1831_v45, %v1200_v49 }
 0xad5   : > { %v1205_v52 = vsel %vm1204_vm14, %v1831_v45, %v1201_v50  ;;  %v1755_v45 = vld [vmem:[%s2385_s13 + $0x30] sm:$0xff] }
 0xad6   : > { %v1206_v53 = vmul.f32 %v1205_v52, %v1189_v34 }
 0xad8   : > { %v1210_v55 = vmul.f32 %v1804_v51, %v1206_v53 }
 0xada   : > { %v2213_v56 = vadd.f32 %v1805_v54, %v1210_v55 }
 0xadc   : > { %1738 = vmatmul.msk.f32.vlgmr.msra.gmra.mxu1 %vm827_vm1, %v2213_v56 }
 0xb59   : > { %v1245_v58 = vpop.f32.mrf.mxu1 }
 0xb5a   : > { %v1246_v59 = vadd.f32 %v1806_v57, %v1245_v58  ;;  %v1808_v57 = vld [vmem:[%s2383_s11 + $0x1] ss:$0 sm:$0xff] }
 0xb5c   : > { %1314 = vrot.lane.b32.xlu0 %v1246_v59, %s2428_s29  ;;  %1316 = vrot.lane.b32.xlu1 %v1246_v59, %s2429_s2  ;;  %s2433_s2 = smov 16  }
 0xb5d   : > { %1249 = vrot.lane.b32.xlu2 %v1246_v59, %s2430_s8  ;;  %s773_s8 = scalar_lea.vmem %s2397_s25, %s2435_s30 }
 0xbb7   : > { %v1250_v60 = vpop.permute.xlu2 %1249 }
 0xbb8   : > { %1739 = vmatpush.xpose.msk.msrb.mxu3 %vm902_vm6, %v1250_v60  ;;  %v1809_v60 = vld [vmem:[%s2384_s12 + $0x1] ss:$0 sm:$0xff] }
 0xbbb   : > { %1740 = vmatmul.msk.f32.vlgmr.msrb.gmra.mxu3 %vm902_vm6, %v1246_v59 }
 0xbce   : > { %v1317_v61 = vpop.permute.xlu1 %1316  ;;  %v1315_v62 = vpop.permute.xlu0 %1314 }
 0xbcf   : > { %1742 = vmatpush.xpose.msk.msra.mxu3 %vm902_vm6, %v1317_v61 }
 0xbd2   : > { %1743 = vmatmul.msk.f32.vlgmr.msra.gmra.mxu3 %vm902_vm6, %v1315_v62 }
 0xc3e   : > { %v1272_v63 = vpop.f32.mrf.mxu3 }
 0xc3f   : > { %v1275_v0 = vmul.f32 0.25, %v1272_v63  ;;  %v1766_v63 = vld [vmem:[%s2387_s15 + $0x78] sm:$0xff] }
 0xc40   : > { %1521 = vmatpush.msrb.mxu3 %v1766_v63  ;;  %v1629_v63 = vld [vmem:[#allocation2] sm:$0x1] }
 0xc41   : > { %v1276_v1 = vadd.f32 %v1275_v0, %v2104_v4  ;;  %v1765_v0 = vld [vmem:[%s2387_s15 + $0x70] sm:$0xff] }
 0xc42   : > { %1522 = vmatpush.msrb.mxu3 %v1765_v0 }
 0xc43   : > { %v1277_v2 = vsel %vm932_vm7, %v1276_v1, -inf }
 0xc44   : > { %1278 = vmax.xlane.f32.xlu1 %v1277_v2  ;;  %v1763_v2 = vld [vmem:[%s2387_s15 + $0x60] sm:$0xff] }
 0xc55   : > { %v1339_v3 = vpop.f32.mrf.mxu3 }
 0xc56   : > { %v1342_v5 = vmul.f32 0.25, %v1339_v3  ;;  %v1762_v3 = vld [vmem:[%s2387_s15 + $0x58] sm:$0xff] }
 0xc58   : > { %v1343_v6 = vadd.f32 %v1342_v5, %v2104_v4  ;;  %v1761_v5 = vld [vmem:[%s2387_s15 + $0x50] sm:$0xff] }
 0xc5a   : > { %v1344_v7 = vsel %vm932_vm7, %v1343_v6, -inf }
 0xc5b   : > { %1345 = vmax.xlane.f32.xlu2 %v1344_v7  ;;  %v1759_v7 = vld [vmem:[%s2387_s15 + $0x40] sm:$0xff] }
 0xc73   : > { %1355 = vrot.lane.b32.xlu2 %v1246_v59, %s2431_s3 }
 0xcb7   : > { %v1279_v8 = vpop.xlane.xlu1 %1278 }
 0xcb8   : > { %v1280_v9 = vsub.f32 %v1276_v1, %v1279_v8  ;;  %v1764_v1 = vld [vmem:[%s2387_s15 + $0x68] sm:$0xff]  ;;  %v1810_v8 = vld [vmem:[%s2386_s14 + $0x1] ss:$0 sm:$0xff] }
 0xcb9   : > { %1523 = vmatpush.msrb.mxu3 %v1764_v1 }
 0xcba   : > { %v1281_v10 = vmul.f32 1.442695, %v1280_v9 }
 0xcbb   : > { %1524 = vmatpush.msrb.mxu3 %v1763_v2 }
 0xcbc   : > { %1832 = vpow2.f32 %v1281_v10 }
 0xcbd   : > { %1525 = vmatpush.msrb.mxu3 %v1762_v3 }
 0xcbf   : > { %1526 = vmatpush.msrb.mxu3 %v1761_v5 }
 0xcc2   : > { %v1833_v11 = vpop.eup %1832 }
 0xcc3   : > { %v1283_v12 = vsel %vm932_vm7, %v1833_v11, 0.0 }
 0xcc4   : > { %1284 = vadd.xlane.f32.xlu1 %v1283_v12 }
 0xcce   : > { %v1346_v13 = vpop.xlane.xlu2 %1345 }
 0xccf   : > { %v1347_v14 = vsub.f32 %v1343_v6, %v1346_v13  ;;  %v1760_v6 = vld [vmem:[%s2387_s15 + $0x48] sm:$0xff] }
 0xcd0   : > { %1527 = vmatpush.msrb.mxu3 %v1760_v6 }
 0xcd1   : > { %v1348_v15 = vmul.f32 1.442695, %v1347_v14 }
 0xcd2   : > { %1528 = vmatpush.msrb.mxu3 %v1759_v7 }
 0xcd3   : > { %1834 = vpow2.f32 %v1348_v15 }
 0xcd6   : > { %v1356_v16 = vpop.permute.xlu2 %1355 }
 0xcd7   : > { %1376 = vmatpush.msrb.mxu2 %v1356_v16 }
 0xcd9   : > { %v1835_v4 = vpop.eup %1834  ;;  %1588 = vmatpush.msra.mxu2 %v1571_v29 }
 0xcda   : > { %v1350_v17 = vsel %vm932_vm7, %v1835_v4, 0.0 }
 0xcdb   : > { %1351 = vadd.xlane.f32.xlu0 %v1350_v17 }
 0xcdd   : > { %1288 = vrot.lane.b32.xlu1 %v1246_v59, %s2432_s0 }
 0xd37   : > { %v1285_v18 = vpop.xlane.xlu1 %1284 }
 0xd38   : > { %1836 = vrcp.f32 %v1285_v18 }
 0xd3e   : > { %v1837_v19 = vpop.eup %1836 }
 0xd3f   : > { %v1287_v21 = vmul.f32 %v1837_v19, %v1833_v11  ;;  %v1811_v19 = vld [vmem:[%s2388_s16 + $0x1] ss:$0 sm:$0xff] }
 0xd4e   : > { %v1352_v20 = vpop.xlane.xlu0 %1351 }
 0xd4f   : > { %1838 = vrcp.f32 %v1352_v20  ;;  %v1289_v22 = vpop.permute.xlu1 %1288 }
 0xd50   : > { %1309 = vmatpush.msrb.mxu1 %v1289_v22 }
 0xd51   : > { %1741 = vmatmul.msk.f32.vlgmr.msrb.gmra.mxu1 %vm932_vm7, %v1287_v21 }
 0xd52   : > { %1479 = vmatpush.msra.mxu1 %v1756_v44 }
 0xd54   : > { %1480 = vmatpush.msra.mxu1 %v1755_v45  ;;  %v1812_v45 = vld [vmem:[%s2389_s17 + $0x1] ss:$0 sm:$0xff] }
 0xd55   : > { %v1839_v23 = vpop.eup %1838 }
 0xd56   : > { %v1354_v24 = vmul.f32 %v1839_v23, %v1835_v4  ;;  %1481 = vmatpush.msra.mxu1 %v1754_v46 }
 0xd58   : > { %1744 = vmatmul.msk.f32.vlgmr.msrb.gmra.mxu2 %vm932_vm7, %v1354_v24  ;;  %1482 = vmatpush.msra.mxu1 %v1753_v47 }
 0xdce   : > { %v1311_v30 = vpop.f32.mrf.mxu1 }
 0xddb   : > { %v1378_v28 = vpop.f32.mrf.mxu2 }
 0xddc   : > { %1382 = vrot.lane.b32.xlu0 %v1378_v28, %s2433_s2 }
 0xe4e   : > { %v1383_v31 = vpop.permute.xlu0 %1382 }
 0xe4f   : > { %v1385_v32 = vsel %vm902_vm6, %v1311_v30, %v1383_v31  ;;  %v1570_v30 = vld [vmem:[%s2391_s19 + $0x10] sm:$0xff]  ;;  %v1569_v31 = vld [vmem:[%s2391_s19 + $0x8] sm:$0xff] }
 0xe50   : > { %1750 = vmatmul.msk.f32.vlgmr.msrb.gmra.mxu0 %vm827_vm1, %v1385_v32  ;;  %1589 = vmatpush.msra.mxu2 %v1570_v30  ;;  %v1568_v32 = vld [vmem:[%s2391_s19] sm:$0xff] }
 0xe52   : > { %1590 = vmatpush.msra.mxu2 %v1569_v31 }
 0xe54   : > { %1591 = vmatpush.msra.mxu2 %v1568_v32 }
 0xecd   : > { %v1416_v34 = vpop.f32.mrf.mxu0 }
 0xece   : > { %v1417_v36 = vadd.f32 %v1807_v33, %v1416_v34  ;;  %v1599_v33 = vld [vmem:[%s2393_s21 + $0x18] sm:$0xff]  ;;  %v1598_v34 = vld [vmem:[%s2393_s21 + $0x10] sm:$0xff] }
 0xecf   : > { %1616 = vmatpush.msra.mxu0 %v1599_v33 }
 0xed0   : > { %v1419_v37 = vadd.f32 %v1417_v36, %v2213_v56 }
 0xed1   : > { %1617 = vmatpush.msra.mxu0 %v1598_v34 }
 0xed2   : > { %v1424_v38 = vsel %vm827_vm1, %v1419_v37, 0.0 }
 0xed3   : > { %1425 = vadd.xlane.f32.xlu2 %v1424_v38 }
 0xf46   : > { %v1426_v39 = vpop.xlane.xlu2 %1425 }
 0xf47   : > { %v1427_v40 = vmul.f32 %v1426_v39, %v2065_v35 }
 0xf49   : > { %v1428_v41 = vsub.f32 %v1419_v37, %v1427_v40 }
 0xf4b   : > { %v1429_v42 = vmul.f32 %v1428_v41, %v1428_v41 }
 0xf4d   : > { %v1430_v43 = vsel %vm827_vm1, %v1429_v42, 0.0 }
 0xf4e   : > { %1431 = vadd.xlane.f32.xlu1 %v1430_v43 }
 0xfc1   : > { %v1432_v48 = vpop.xlane.xlu1 %1431 }
 0xfc2   : > { %v1433_v49 = vmul.f32 %v1432_v48, %v2065_v35 }
 0xfc4   : > { %v1434_v50 = vadd.f32 1e-12, %v1433_v49 }
 0xfc6   : > { %1840 = vrsqrt.f32 %v1434_v50  ;;  %vm1441_vm0 = vweird.f32 %v1434_v50 }
 0xfcc   : > { %v1841_v51 = vpop.eup %1840 }
 0xfcd   : > { %v1436_v52 = vmul.f32 %v1841_v51, %v1434_v50  ;;  %vm1442_vm15 = vweird.f32 %v1841_v51  ;;  %v1597_v50 = vld [vmem:[%s2393_s21 + $0x8] sm:$0xff] }
 0xfce   : > { %vm1443_vm2 = vmor %vm1441_vm0, %vm1442_vm15  ;;  %1618 = vmatpush.msra.mxu0 %v1597_v50 }
 0xfcf   : > { %v1437_v53 = vmul.f32 %v1841_v51, %v1436_v52  ;;  %v1628_v52 = vld [vmem:[%s2395_s23 + $0x18] sm:$0xff] }
 0xfd0   : > { %1645 = vmatpush.msrb.mxu1 %v1628_v52 }
 0xfd1   : > { %v1438_v54 = vmul.f32 0.5, %v1437_v53  ;;  %v1572_v53 = vld [vmem:[%s2392_s20] sm:$0x1] }
 0xfd3   : > { %v1439_v55 = vsub.f32 1.5, %v1438_v54 }
 0xfd5   : > { %v1440_v56 = vmul.f32 %v1841_v51, %v1439_v55 }
 0xfd7   : > { %v1444_v58 = vsel %vm1443_vm2, %v1841_v51, %v1440_v56  ;;  %v1596_v51 = vld [vmem:[%s2393_s21] sm:$0xff]  ;;  %v1627_v56 = vld [vmem:[%s2395_s23 + $0x10] sm:$0xff] }
 0xfd8   : > { %v1445_v59 = vmul.f32 %v1444_v58, %v1428_v41  ;;  %1619 = vmatpush.msra.mxu0 %v1596_v51  ;;  %1646 = vmatpush.msrb.mxu1 %v1627_v56  ;;  %v1625_v58 = vld [vmem:[%s2395_s23] sm:$0xff] }
 0xfda   : > { %v1449_v61 = vmul.f32 %v1808_v57, %v1445_v59  ;;  %v1626_v57 = vld [vmem:[%s2395_s23 + $0x8] sm:$0xff]  ;;  %v1600_v59 = vld [vmem:[%s2394_s22] sm:$0x1] }
 0xfdb   : > { %1647 = vmatpush.msrb.mxu1 %v1626_v57 }
 0xfdc   : > { %v1453_v62 = vadd.f32 %v1809_v60, %v1449_v61 }
 0xfdd   : > { %1648 = vmatpush.msrb.mxu1 %v1625_v58 }
 0xfde   : > { %1758 = vmatmul.msk.f32.vlgmr.msra.gmra.mxu1 %vm827_vm1, %v1453_v62 }
0x105b   : > { %v1484_v9 = vpop.f32.mrf.mxu1 }
0x105c   : > { %v1485_v10 = vadd.f32 %v1810_v8, %v1484_v9 }
0x105e   : > { %v1487_v11 = vmul.f32 %v1485_v10, %v1485_v10 }
0x1060   : > { %v1488_v12 = vmul.f32 %v1487_v11, %v1485_v10 }
0x1062   : > { %v1489_v13 = vmul.f32 0.044715, %v1488_v12 }
0x1064   : > { %v1490_v14 = vadd.f32 %v1489_v13, %v1485_v10 }
0x1066   : > { %v1491_v15 = vmul.f32 0.7978846, %v1490_v14 }
0x1068   : > { %1842 = vtanh.f32 %v1491_v15 }
0x106e   : > { %v1843_v16 = vpop.eup %1842 }
0x106f   : > { %v1493_v4 = vadd.f32 1.0, %v1843_v16 }
0x1071   : > { %v1494_v17 = vmul.f32 0.5, %v1493_v4 }
0x1073   : > { %v1495_v18 = vmul.f32 %v1494_v17, %v1485_v10 }
0x1075   : > { %1768 = vmatmul.msk.f32.vlgmr.msrb.gmra.mxu3 %vm1158_vm11, %v1495_v18 }
0x10f8   : > { %v1530_v20 = vpop.f32.mrf.mxu3 }
0x10f9   : > { %v1531_v21 = vadd.f32 %v1811_v19, %v1530_v20 }
0x10fb   : > { %v1533_v22 = vadd.f32 %v1531_v21, %v1453_v62 }
0x10fd   : > { %v1538_v23 = vsel %vm827_vm1, %v1533_v22, 0.0 }
0x10fe   : > { %1539 = vadd.xlane.f32.xlu0 %v1538_v23 }
0x1171   : > { %v1540_v24 = vpop.xlane.xlu0 %1539 }
0x1172   : > { %v1541_v25 = vmul.f32 %v1540_v24, %v2065_v35 }
0x1174   : > { %v1542_v26 = vsub.f32 %v1533_v22, %v1541_v25 }
0x1176   : > { %v1543_v27 = vmul.f32 %v1542_v26, %v1542_v26 }
0x1178   : > { %v1544_v28 = vsel %vm827_vm1, %v1543_v27, 0.0 }
0x1179   : > { %1545 = vadd.xlane.f32.xlu2 %v1544_v28 }
0x11ec   : > { %v1546_v36 = vpop.xlane.xlu2 %1545 }
0x11ed   : > { %v1547_v37 = vmul.f32 %v1546_v36, %v2065_v35  ;;  %v1813_v35 = vld [vmem:[%s2390_s18 + $0x1] ss:$0 sm:$0xff] }
0x11ef   : > { %v1548_v38 = vadd.f32 1e-12, %v1547_v37 }
0x11f1   : > { %1844 = vrsqrt.f32 %v1548_v38  ;;  %vm1555_vm4 = vweird.f32 %v1548_v38 }
0x11f7   : > { %v1845_v39 = vpop.eup %1844 }
0x11f8   : > { %v1550_v40 = vmul.f32 %v1845_v39, %v1548_v38  ;;  %vm1556_vm3 = vweird.f32 %v1845_v39 }
0x11f9   : > { %vm1557_vm5 = vmor %vm1555_vm4, %vm1556_vm3 }
0x11fa   : > { %v1551_v41 = vmul.f32 %v1845_v39, %v1550_v40 }
0x11fc   : > { %v1552_v42 = vmul.f32 0.5, %v1551_v41 }
0x11fe   : > { %v1553_v43 = vsub.f32 1.5, %v1552_v42 }
0x1200   : > { %v1554_v44 = vmul.f32 %v1845_v39, %v1553_v43 }
0x1202   : > { %v1558_v46 = vsel %vm1557_vm5, %v1845_v39, %v1554_v44 }
0x1203   : > { %v1559_v47 = vmul.f32 %v1558_v46, %v1542_v26 }
0x1205   : > { %v1563_v48 = vmul.f32 %v1812_v45, %v1559_v47 }
0x1207   : > { %v1567_v49 = vadd.f32 %v1813_v35, %v1563_v48 }
0x1209   : > { %1771 = vmatmul.msk.f32.vlgmr.msra.gmra.mxu2 %vm827_vm1, %v1567_v49 }
0x128c   : > { %v1593_v54 = vpop.f32.mrf.mxu2 }
0x128d   : > { %v1594_v55 = vadd.f32 %v1593_v54, %v1572_v53 }
0x128f   : > { %1772 = vmatmul.msk.f32.vlgmr.msra.gmra.mxu0 %vm827_vm1, %v1594_v55 }
0x130c   : > { %v1621_v60 = vpop.f32.mrf.mxu0 }
0x130d   : > { %v1622_v61 = vadd.f32 %v1621_v60, %v1600_v59 }
0x130f   : > { %v1624_v62 = vmax.f32 %v1622_v61, 0.0 }
0x1311   : > { %1773 = vmatmul.msk.f32.vlgmr.msrb.gmra.mxu1 %vm827_vm1, %v1624_v62 }
0x138e   : > { %v1650_v0 = vpop.f32.mrf.mxu1 }
0x138f   : > { %v1651_v1 = vadd.f32 %v1650_v0, %v1629_v63 }
0x1391   : > { %1655 = vperm.xlu2 %1794, %v1651_v1  }
0x13eb   : > { %v1656_v2 = vpop.permute.xlu2 %1655 }
0x13ec   : > { %1658 = vst [vmem:[%s773_s8] sm:$0x1] %v1656_v2 }
0x13ed PF: > { %s37_s6 = sadd.s32 1, %s1852_s6  }
0x13ee   : > { %p34_p4 = scmp.ge.s32.totalorder %s37_s6, 8  }
0x13f0   :  { %36 = sbr.rel (!%p34_p4) target bundleno = 11 (0xb), region = 165 }

</bundles_post_ra>
